<compile_context>
chip_gen: v6e
topology: v6e:2x2x1
jax: 0.10.0
libtpu: 0.0.40
codegen_flags: <defaults>
</compile_context>

<pallas_src>
import jax
import jax.numpy as jnp
from jax import lax
from jax.experimental import pallas as pl
from jax.experimental.pallas import tpu as pltpu


def _round_up(x: int, m: int) -> int:
    return -(-x // m) * m


def _vmem_capacity_bytes() -> int:
    """Physical per-TensorCore VMEM (v5e/v6e: 128 MiB, v7x: 64 MiB)."""
    try:
        cap = getattr(pltpu.get_tpu_info(), "vmem_capacity_bytes", None)
        if cap:
            return int(cap)
    except Exception:
        pass
    return 64 * 1024 * 1024  # conservative: assume v7x


# ---------------------------------------------------------------------------
# Fast path: embedding table resident in VMEM (small / medium vocabs).
# ---------------------------------------------------------------------------
def _make_vmem_gather_kernel(tokens_per_block: int, unroll: int):
    def kernel(ids_ref, table_ref, out_ref):
        # ids_ref:   SMEM scalar-prefetch (n_padded,) int32 token ids
        # table_ref: (V, D) VMEM-resident table (constant block, stays put)
        # out_ref:   (T, D) VMEM output block for this grid step
        base = pl.program_id(0) * tokens_per_block

        def body(r, carry):
            row = ids_ref[base + r]
            # Pure VMEM row copy: no DMA descriptor, no HBM latency.
            out_ref[pl.ds(r, 1), :] = table_ref[pl.ds(row, 1), :]
            return carry

        lax.fori_loop(0, tokens_per_block, body, 0, unroll=unroll)

    return kernel


# ---------------------------------------------------------------------------
# Fallback: table stays in HBM, rows gathered with manual row DMAs.
# ---------------------------------------------------------------------------
def _make_hbm_gather_kernel(tokens_per_block: int, n_inflight: int,
                            pad_id: int, unroll: int):
    def kernel(ids_ref, table_hbm, out_ref, pad_row, sems):
        # ids_ref: SMEM (n_padded,) int32; table_hbm: (V, D) in HBM (pl.ANY)
        # out_ref: (T, D) VMEM output block; pad_row: (1, D) VMEM scratch
        # sems: (n_inflight + 1,) DMA semaphores (last one for the pad fetch)
        base = pl.program_id(0) * tokens_per_block

        # Pad-token dedup: fetch table[pad_id] once per grid step into VMEM.
        # (Scratch is per-core, so do it every step, not only on step 0.)
        pad_cp = pltpu.make_async_copy(
            table_hbm.at[pl.ds(pad_id, 1), :], pad_row, sems.at[n_inflight])
        pad_cp.start()
        pad_cp.wait()

        def issue(r):
            row = ids_ref[base + r]
            sem = sems.at[r % n_inflight]
            is_pad = row == pad_id

            @pl.when(is_pad)
            def _():
                # Local VMEM->VMEM copy; byte count identical to the HBM
                # branch, so the rolling wait below stays balanced.
                pltpu.make_async_copy(
                    pad_row, out_ref.at[pl.ds(r, 1), :], sem).start()

            @pl.when(jnp.logical_not(is_pad))
            def _():
                pltpu.make_async_copy(
                    table_hbm.at[pl.ds(row, 1), :],
                    out_ref.at[pl.ds(r, 1), :],
                    sem,
                ).start()

        # Prime the window: n_inflight outstanding row fetches.
        for r in range(n_inflight):
            issue(r)

        def body(r, carry):
            # Issue AHEAD of the wait: keeps descriptor issue dense.  Safe
            # because the data landing in out_ref is never read inside the
            # kernel, and every wait retires exactly one equal-sized transfer,
            # so all row DMAs are accounted for by the time the loop exits.
            @pl.when(r + n_inflight < tokens_per_block)
            def _():
                issue(r + n_inflight)

            # Wait descriptor invariant: only the (1, D) transfer byte count
            # matters and it matches every copy issued on this semaphore slot
            # (all row copies move exactly one table row into out_ref).
            pltpu.make_async_copy(
                table_hbm.at[pl.ds(0, 1), :],
                out_ref.at[pl.ds(r, 1), :],
                sems.at[r % n_inflight],
            ).wait()
            return carry

        lax.fori_loop(0, tokens_per_block, body, 0, unroll=unroll)

    return kernel


def embedding_lookup(token_ids, table, *,
                     tokens_per_block=1024, n_inflight=16, unroll=8):
    """out[..., :] = table[token_ids[...]]  (== nn.Embedding forward)."""
    orig_shape = token_ids.shape
    ids = token_ids.reshape(-1).astype(jnp.int32)
    n_tokens = int(ids.shape[0])
    vocab, dim = int(table.shape[0]), int(table.shape[1])
    itemsize = jnp.dtype(table.dtype).itemsize
    pad_id = vocab - 1

    # Token block: sublane aligned (multiple of 8).  A big default amortizes
    # the ~0.35us/step pipeline overhead; for small inputs shrink so there are
    # at least 2 grid blocks (keeps both v7x TensorCores busy).
    tpb = min(int(tokens_per_block), _round_up(n_tokens, 8))
    if n_tokens > 8:
        tpb = min(tpb, _round_up(_round_up(n_tokens, 8) // 2, 8))
    tpb = max(8, (tpb // 8) * 8)
    unroll = max(1, min(int(unroll), tpb))

    n_blocks = pl.cdiv(n_tokens, tpb)
    n_padded = n_blocks * tpb

    # Clamp ids (guards data-dependent addressing against OOB; note: this
    # silently remaps bad ids instead of failing like nn.Embedding) and pad
    # the id stream with the pad row so every grid step gathers a full block.
    ids = jnp.clip(ids, 0, vocab - 1)
    if n_padded != n_tokens:
        ids = jnp.pad(ids, (0, n_padded - n_tokens), constant_values=pad_id)

    out_shape = jax.ShapeDtypeStruct((n_padded, dim), table.dtype)
    cost = pl.CostEstimate(
        flops=0, transcendentals=0,
        bytes_accessed=int(2 * n_padded * dim * itemsize + n_padded * 4))

    # ---- VMEM-resident fast path (gated per generation) --------------------
    vmem_cap = _vmem_capacity_bytes()
    table_bytes = vocab * dim * itemsize
    out_block_bytes = tpb * dim * itemsize
    needed = 2 * table_bytes + 4 * out_block_bytes + (4 << 20)  # generous
    budget = (3 * vmem_cap) // 4   # headroom: ~48 MiB on v7x, ~96 MiB on v5e/v6e

    out = None
    if needed <= budget:
        try:
            out = pl.pallas_call(
                _make_vmem_gather_kernel(tpb, unroll),
                out_shape=out_shape,
                grid_spec=pltpu.PrefetchScalarGridSpec(
                    num_scalar_prefetch=1,                    # ids land in SMEM
                    grid=(n_blocks,),
                    # Full-extent block + constant index_map -> table is DMA'd
                    # to VMEM once and kept resident across grid steps.
                    in_specs=[pl.BlockSpec((vocab, dim), lambda i, ids_s: (0, 0))],
                    out_specs=pl.BlockSpec((tpb, dim), lambda i, ids_s: (i, 0)),
                ),
                compiler_params=pltpu.CompilerParams(
                    dimension_semantics=("parallel",),
                    vmem_limit_bytes=int(min(max(needed, 32 << 20), budget)),
                ),
                cost_estimate=cost,
            )(ids, table)
        except Exception:
            out = None   # lowering/runtime issue -> use the HBM-DMA fallback

    # ---- HBM-DMA fallback (large vocabs, e.g. 400k-row GloVe) --------------
    if out is None:
        nin = max(1, min(int(n_inflight), tpb))
        out = pl.pallas_call(
            _make_hbm_gather_kernel(tpb, nin, pad_id, unroll),
            out_shape=out_shape,
            grid_spec=pltpu.PrefetchScalarGridSpec(
                num_scalar_prefetch=1,                        # ids land in SMEM
                grid=(n_blocks,),
                in_specs=[pl.BlockSpec(memory_space=pl.ANY)],  # table stays in HBM
                out_specs=pl.BlockSpec((tpb, dim), lambda i, ids_s: (i, 0)),
                scratch_shapes=[
                    pltpu.VMEM((1, dim), table.dtype),         # pad-row cache
                    pltpu.SemaphoreType.DMA((nin + 1,)),       # window + pad fetch
                ],
            ),
            compiler_params=pltpu.CompilerParams(
                dimension_semantics=("parallel",),
            ),
            cost_estimate=cost,
        )(ids, table)

    out = out[:n_tokens]
    return out.reshape(*orig_shape, dim)


class GetEmbedding:
    """JAX/Pallas port of get_embedding (synthetic deterministic GloVe table)."""

    def __init__(self, vocab_size, glove_dim, key, dtype=jnp.float32):
        self.vocab_size = vocab_size
        self.word_dim = glove_dim
        # Deterministic synthetic stand-in for np.load(glove_file).  Passing
        # dtype=jnp.bfloat16 halves every gather/writeback byte (biggest
        # relative win on v5e); default stays float32 to match the PyTorch
        # nn.Embedding numerics exactly.
        self.glove_weight = jax.random.normal(
            key, (vocab_size, glove_dim), dtype=jnp.float32).astype(dtype)

    def __call__(self, token_ids):
        # token_ids: (B, L) int32 — already word2id-mapped and padded with
        # (vocab_size - 1), as the PyTorch forward does on the host.
        # TODO(synk): word2id dict lookup over Python strings and ragged-list
        # padding are host-side preprocessing with no Pallas equivalent; the
        # kernel starts from integer token ids.
        return embedding_lookup(token_ids, self.glove_weight)


if __name__ == "__main__":
    key = jax.random.PRNGKey(0)
    k_tbl, k_ids = jax.random.split(key)

    vocab_size = 128     # stands in for args.vocab_size (400000 in the original)
    glove_dim = 128      # stands in for args.glove_dim
    batch = 2
    max_len = 8          # max sentence length after padding

    model = GetEmbedding(vocab_size, glove_dim, k_tbl)

    # Build "sentences" of unequal length, mimic the module's padding with
    # vocab_size - 1 up to max_len.
    raw_ids = jax.random.randint(
        k_ids, (batch, max_len), 0, vocab_size, dtype=jnp.int32
    )
    lengths = jnp.array([max_len, 5], dtype=jnp.int32)
    pos = jnp.arange(max_len)[None, :]
    token_ids = jnp.where(pos < lengths[:, None], raw_ids, vocab_size - 1)

    out = model(token_ids)
    out = jax.block_until_ready(out)

    # Reference check against a plain-JAX gather (== nn.Embedding forward).
    ref = jnp.take(model.glove_weight, token_ids.reshape(-1), axis=0).reshape(
        batch, max_len, glove_dim
    )
    assert out.shape == (batch, max_len, glove_dim)
    assert jnp.allclose(out, ref), "Pallas embedding gather mismatch"

    print("KERNEL_OK")
</pallas_src>

<mosaic_0001>
module attributes {stable_mosaic.version = 11 : i64} {
  func.func @kernel(%arg0: i32, %arg1: memref<16xi32, #tpu.memory_space<smem>>, %arg2: memref<128x128xf32, #tpu.memory_space<vmem>>, %arg3: memref<8x128xf32, #tpu.memory_space<vmem>>) attributes {dimension_semantics = [#tpu.dimension_semantics<parallel>], iteration_bounds = array<i64: 2>, scalar_prefetch = 1 : i64, scratch_operands = 0 : i64, tpu.core_type = #tpu.core_type<tc>, window_params = [{pipeline_mode = #tpu.pipeline_mode<synchronous>, transform_indices = @transform_0, window_bounds = array<i64: 128, 128>}, {transform_indices = @transform_1, window_bounds = array<i64: 8, 128>}]} {
    %c8_i32 = arith.constant 8 : i32
    %0 = arith.muli %arg0, %c8_i32 : i32
    %c0_i32 = arith.constant 0 : i32
    %1 = arith.addi %0, %c0_i32 : i32
    %2 = arith.index_cast %1 : i32 to index
    %3 = memref.load %arg1[%2] : memref<16xi32, #tpu.memory_space<smem>>
    %4 = arith.index_cast %3 : i32 to index
    %c0 = arith.constant 0 : index
    %5 = vector.load %arg2[%4, %c0] : memref<128x128xf32, #tpu.memory_space<vmem>>, vector<1x128xf32>
    %6 = arith.index_cast %c0_i32 : i32 to index
    %c0_0 = arith.constant 0 : index
    %7 = vector.load %arg3[%6, %c0_0] : memref<8x128xf32, #tpu.memory_space<vmem>>, vector<1x128xf32>
    tpu.vector_store %arg3[%6, %c0_0], %5 {strides = array<i32>} : memref<8x128xf32, #tpu.memory_space<vmem>>, vector<1x128xf32>,
    %c1_i32 = arith.constant 1 : i32
    %8 = arith.addi %0, %c1_i32 : i32
    %9 = arith.index_cast %8 : i32 to index
    %10 = memref.load %arg1[%9] : memref<16xi32, #tpu.memory_space<smem>>
    %11 = arith.index_cast %10 : i32 to index
    %c0_1 = arith.constant 0 : index
    %12 = vector.load %arg2[%11, %c0_1] : memref<128x128xf32, #tpu.memory_space<vmem>>, vector<1x128xf32>
    %13 = arith.index_cast %c1_i32 : i32 to index
    %c0_2 = arith.constant 0 : index
    %14 = vector.load %arg3[%13, %c0_2] : memref<8x128xf32, #tpu.memory_space<vmem>>, vector<1x128xf32>
    tpu.vector_store %arg3[%13, %c0_2], %12 {strides = array<i32>} : memref<8x128xf32, #tpu.memory_space<vmem>>, vector<1x128xf32>,
    %c2_i32 = arith.constant 2 : i32
    %15 = arith.addi %0, %c2_i32 : i32
    %16 = arith.index_cast %15 : i32 to index
    %17 = memref.load %arg1[%16] : memref<16xi32, #tpu.memory_space<smem>>
    %18 = arith.index_cast %17 : i32 to index
    %c0_3 = arith.constant 0 : index
    %19 = vector.load %arg2[%18, %c0_3] : memref<128x128xf32, #tpu.memory_space<vmem>>, vector<1x128xf32>
    %20 = arith.index_cast %c2_i32 : i32 to index
    %c0_4 = arith.constant 0 : index
    %21 = vector.load %arg3[%20, %c0_4] : memref<8x128xf32, #tpu.memory_space<vmem>>, vector<1x128xf32>
    tpu.vector_store %arg3[%20, %c0_4], %19 {strides = array<i32>} : memref<8x128xf32, #tpu.memory_space<vmem>>, vector<1x128xf32>,
    %c3_i32 = arith.constant 3 : i32
    %22 = arith.addi %0, %c3_i32 : i32
    %23 = arith.index_cast %22 : i32 to index
    %24 = memref.load %arg1[%23] : memref<16xi32, #tpu.memory_space<smem>>
    %25 = arith.index_cast %24 : i32 to index
    %c0_5 = arith.constant 0 : index
    %26 = vector.load %arg2[%25, %c0_5] : memref<128x128xf32, #tpu.memory_space<vmem>>, vector<1x128xf32>
    %27 = arith.index_cast %c3_i32 : i32 to index
    %c0_6 = arith.constant 0 : index
    %28 = vector.load %arg3[%27, %c0_6] : memref<8x128xf32, #tpu.memory_space<vmem>>, vector<1x128xf32>
    tpu.vector_store %arg3[%27, %c0_6], %26 {strides = array<i32>} : memref<8x128xf32, #tpu.memory_space<vmem>>, vector<1x128xf32>,
    %c4_i32 = arith.constant 4 : i32
    %29 = arith.addi %0, %c4_i32 : i32
    %30 = arith.index_cast %29 : i32 to index
    %31 = memref.load %arg1[%30] : memref<16xi32, #tpu.memory_space<smem>>
    %32 = arith.index_cast %31 : i32 to index
    %c0_7 = arith.constant 0 : index
    %33 = vector.load %arg2[%32, %c0_7] : memref<128x128xf32, #tpu.memory_space<vmem>>, vector<1x128xf32>
    %34 = arith.index_cast %c4_i32 : i32 to index
    %c0_8 = arith.constant 0 : index
    %35 = vector.load %arg3[%34, %c0_8] : memref<8x128xf32, #tpu.memory_space<vmem>>, vector<1x128xf32>
    tpu.vector_store %arg3[%34, %c0_8], %33 {strides = array<i32>} : memref<8x128xf32, #tpu.memory_space<vmem>>, vector<1x128xf32>,
    %c5_i32 = arith.constant 5 : i32
    %36 = arith.addi %0, %c5_i32 : i32
    %37 = arith.index_cast %36 : i32 to index
    %38 = memref.load %arg1[%37] : memref<16xi32, #tpu.memory_space<smem>>
    %39 = arith.index_cast %38 : i32 to index
    %c0_9 = arith.constant 0 : index
    %40 = vector.load %arg2[%39, %c0_9] : memref<128x128xf32, #tpu.memory_space<vmem>>, vector<1x128xf32>
    %41 = arith.index_cast %c5_i32 : i32 to index
    %c0_10 = arith.constant 0 : index
    %42 = vector.load %arg3[%41, %c0_10] : memref<8x128xf32, #tpu.memory_space<vmem>>, vector<1x128xf32>
    tpu.vector_store %arg3[%41, %c0_10], %40 {strides = array<i32>} : memref<8x128xf32, #tpu.memory_space<vmem>>, vector<1x128xf32>,
    %c6_i32 = arith.constant 6 : i32
    %43 = arith.addi %0, %c6_i32 : i32
    %44 = arith.index_cast %43 : i32 to index
    %45 = memref.load %arg1[%44] : memref<16xi32, #tpu.memory_space<smem>>
    %46 = arith.index_cast %45 : i32 to index
    %c0_11 = arith.constant 0 : index
    %47 = vector.load %arg2[%46, %c0_11] : memref<128x128xf32, #tpu.memory_space<vmem>>, vector<1x128xf32>
    %48 = arith.index_cast %c6_i32 : i32 to index
    %c0_12 = arith.constant 0 : index
    %49 = vector.load %arg3[%48, %c0_12] : memref<8x128xf32, #tpu.memory_space<vmem>>, vector<1x128xf32>
    tpu.vector_store %arg3[%48, %c0_12], %47 {strides = array<i32>} : memref<8x128xf32, #tpu.memory_space<vmem>>, vector<1x128xf32>,
    %c7_i32 = arith.constant 7 : i32
    %50 = arith.addi %0, %c7_i32 : i32
    %51 = arith.index_cast %50 : i32 to index
    %52 = memref.load %arg1[%51] : memref<16xi32, #tpu.memory_space<smem>>
    %53 = arith.index_cast %52 : i32 to index
    %c0_13 = arith.constant 0 : index
    %54 = vector.load %arg2[%53, %c0_13] : memref<128x128xf32, #tpu.memory_space<vmem>>, vector<1x128xf32>
    %55 = arith.index_cast %c7_i32 : i32 to index
    %c0_14 = arith.constant 0 : index
    %56 = vector.load %arg3[%55, %c0_14] : memref<8x128xf32, #tpu.memory_space<vmem>>, vector<1x128xf32>
    tpu.vector_store %arg3[%55, %c0_14], %54 {strides = array<i32>} : memref<8x128xf32, #tpu.memory_space<vmem>>, vector<1x128xf32>,
    %c8_i32_15 = arith.constant 8 : i32
    return
  }
  func.func @transform_0(%arg0: i32, %arg1: memref<16xi32, #tpu.memory_space<smem>>) -> (i32, i32) {
    %c0_i32 = arith.constant 0 : i32
    %c0_i32_0 = arith.constant 0 : i32
    %c0_i32_1 = arith.constant 0 : i32
    return %c0_i32, %c0_i32_0 : i32, i32
  }
  func.func @transform_1(%arg0: i32, %arg1: memref<16xi32, #tpu.memory_space<smem>>) -> (i32, i32) {
    %c0_i32 = arith.constant 0 : i32
    %c0_i32_0 = arith.constant 0 : i32
    return %arg0, %c0_i32 : i32, i32
  }
}

module attributes {stable_mosaic.version = 11 : i64} {
  func.func @kernel(%arg0: i32, %arg1: memref<16xi32, #tpu.memory_space<smem>>, %arg2: memref<128x128xf32, #tpu.memory_space<any>>, %arg3: memref<8x128xf32, #tpu.memory_space<vmem>>, %arg4: memref<1x128xf32, #tpu.memory_space<vmem>>, %arg5: memref<9x!tpu.dma_semaphore, #tpu.memory_space<semaphore_mem>>) attributes {dimension_semantics = [#tpu.dimension_semantics<parallel>], iteration_bounds = array<i64: 2>, scalar_prefetch = 1 : i64, scratch_operands = 2 : i64, tpu.core_type = #tpu.core_type<tc>, window_params = [{}, {transform_indices = @transform_1, window_bounds = array<i64: 8, 128>}]} {
    %c8_i32 = arith.constant 8 : i32
    %0 = arith.muli %arg0, %c8_i32 : i32
    %c8_i32_0 = arith.constant 8 : i32
    %c127_i32 = arith.constant 127 : i32
    %c0_i32 = arith.constant 0 : i32
    %1 = tpu.memref_slice %arg2[%c127_i32, %c0_i32] : memref<128x128xf32, #tpu.memory_space<any>> -> memref<1x128xf32, #tpu.memory_space<any>>
    %2 = tpu.memref_slice %arg5[%c8_i32_0] : memref<9x!tpu.dma_semaphore, #tpu.memory_space<semaphore_mem>> -> memref<1x!tpu.dma_semaphore, #tpu.memory_space<semaphore_mem>>
    %3 = tpu.memref_squeeze %2 : memref<1x!tpu.dma_semaphore, #tpu.memory_space<semaphore_mem>> -> memref<!tpu.dma_semaphore, #tpu.memory_space<semaphore_mem>>
    tpu.enqueue_dma source(%1 : memref<1x128xf32, #tpu.memory_space<any>>) target(%arg4 : memref<1x128xf32, #tpu.memory_space<vmem>>) target_semaphore(%3 : memref<!tpu.dma_semaphore, #tpu.memory_space<semaphore_mem>>)
    %c8_i32_1 = arith.constant 8 : i32
    %c127_i32_2 = arith.constant 127 : i32
    %c0_i32_3 = arith.constant 0 : i32
    %4 = tpu.memref_slice %arg2[%c127_i32_2, %c0_i32_3] : memref<128x128xf32, #tpu.memory_space<any>> -> memref<1x128xf32, #tpu.memory_space<any>>
    %5 = tpu.memref_slice %arg5[%c8_i32_1] : memref<9x!tpu.dma_semaphore, #tpu.memory_space<semaphore_mem>> -> memref<1x!tpu.dma_semaphore, #tpu.memory_space<semaphore_mem>>
    %6 = tpu.memref_squeeze %5 : memref<1x!tpu.dma_semaphore, #tpu.memory_space<semaphore_mem>> -> memref<!tpu.dma_semaphore, #tpu.memory_space<semaphore_mem>>
    tpu.wait_dma2 semaphore(%6 : memref<!tpu.dma_semaphore, #tpu.memory_space<semaphore_mem>>) src(%4 : memref<1x128xf32, #tpu.memory_space<any>>) dst(%arg4 : memref<1x128xf32, #tpu.memory_space<vmem>>)
    %c0_i32_4 = arith.constant 0 : i32
    %7 = arith.addi %0, %c0_i32_4 : i32
    %8 = arith.index_cast %7 : i32 to index
    %9 = memref.load %arg1[%8] : memref<16xi32, #tpu.memory_space<smem>>
    %c127_i32_5 = arith.constant 127 : i32
    %10 = arith.cmpi eq, %9, %c127_i32_5 : i32
    %11 = arith.extui %10 : i1 to i32
    %c0_i32_6 = arith.constant 0 : i32
    %c0_i32_7 = arith.constant 0 : i32
    %12 = arith.cmpi ne, %11, %c0_i32_7 : i32
    scf.if %12 {
      %c0_i32_157 = arith.constant 0 : i32
      %c0_i32_158 = arith.constant 0 : i32
      %223 = tpu.memref_slice %arg3[%c0_i32_157, %c0_i32_158] : memref<8x128xf32, #tpu.memory_space<vmem>> -> memref<1x128xf32, #tpu.memory_space<vmem>>
      %224 = tpu.memref_slice %arg5[%c0_i32_6] : memref<9x!tpu.dma_semaphore, #tpu.memory_space<semaphore_mem>> -> memref<1x!tpu.dma_semaphore, #tpu.memory_space<semaphore_mem>>
      %225 = tpu.memref_squeeze %224 : memref<1x!tpu.dma_semaphore, #tpu.memory_space<semaphore_mem>> -> memref<!tpu.dma_semaphore, #tpu.memory_space<semaphore_mem>>
      tpu.enqueue_dma source(%arg4 : memref<1x128xf32, #tpu.memory_space<vmem>>) target(%223 : memref<1x128xf32, #tpu.memory_space<vmem>>) target_semaphore(%225 : memref<!tpu.dma_semaphore, #tpu.memory_space<semaphore_mem>>)
    } else {
    }
    %true = arith.constant true
    %13 = arith.xori %10, %true : i1
    %14 = arith.extui %13 : i1 to i32
    %c0_i32_8 = arith.constant 0 : i32
    %c0_i32_9 = arith.constant 0 : i32
    %15 = arith.cmpi ne, %14, %c0_i32_9 : i32
    scf.if %15 {
      %c0_i32_157 = arith.constant 0 : i32
      %223 = tpu.memref_slice %arg2[%9, %c0_i32_157] : memref<128x128xf32, #tpu.memory_space<any>> -> memref<1x128xf32, #tpu.memory_space<any>>
      %c0_i32_158 = arith.constant 0 : i32
      %c0_i32_159 = arith.constant 0 : i32
      %224 = tpu.memref_slice %arg3[%c0_i32_158, %c0_i32_159] : memref<8x128xf32, #tpu.memory_space<vmem>> -> memref<1x128xf32, #tpu.memory_space<vmem>>
      %225 = tpu.memref_slice %arg5[%c0_i32_8] : memref<9x!tpu.dma_semaphore, #tpu.memory_space<semaphore_mem>> -> memref<1x!tpu.dma_semaphore, #tpu.memory_space<semaphore_mem>>
      %226 = tpu.memref_squeeze %225 : memref<1x!tpu.dma_semaphore, #tpu.memory_space<semaphore_mem>> -> memref<!tpu.dma_semaphore, #tpu.memory_space<semaphore_mem>>
      tpu.enqueue_dma source(%223 : memref<1x128xf32, #tpu.memory_space<any>>) target(%224 : memref<1x128xf32, #tpu.memory_space<vmem>>) target_semaphore(%226 : memref<!tpu.dma_semaphore, #tpu.memory_space<semaphore_mem>>)
    } else {
    }
    %c1_i32 = arith.constant 1 : i32
    %16 = arith.addi %0, %c1_i32 : i32
    %17 = arith.index_cast %16 : i32 to index
    %18 = memref.load %arg1[%17] : memref<16xi32, #tpu.memory_space<smem>>
    %c127_i32_10 = arith.constant 127 : i32
    %19 = arith.cmpi eq, %18, %c127_i32_10 : i32
    %20 = arith.extui %19 : i1 to i32
    %c1_i32_11 = arith.constant 1 : i32
    %c0_i32_12 = arith.constant 0 : i32
    %21 = arith.cmpi ne, %20, %c0_i32_12 : i32
    scf.if %21 {
      %c1_i32_157 = arith.constant 1 : i32
      %c0_i32_158 = arith.constant 0 : i32
      %223 = tpu.memref_slice %arg3[%c1_i32_157, %c0_i32_158] : memref<8x128xf32, #tpu.memory_space<vmem>> -> memref<1x128xf32, #tpu.memory_space<vmem>>
      %224 = tpu.memref_slice %arg5[%c1_i32_11] : memref<9x!tpu.dma_semaphore, #tpu.memory_space<semaphore_mem>> -> memref<1x!tpu.dma_semaphore, #tpu.memory_space<semaphore_mem>>
      %225 = tpu.memref_squeeze %224 : memref<1x!tpu.dma_semaphore, #tpu.memory_space<semaphore_mem>> -> memref<!tpu.dma_semaphore, #tpu.memory_space<semaphore_mem>>
      tpu.enqueue_dma source(%arg4 : memref<1x128xf32, #tpu.memory_space<vmem>>) target(%223 : memref<1x128xf32, #tpu.memory_space<vmem>>) target_semaphore(%225 : memref<!tpu.dma_semaphore, #tpu.memory_space<semaphore_mem>>)
    } else {
    }
    %true_13 = arith.constant true
    %22 = arith.xori %19, %true_13 : i1
    %23 = arith.extui %22 : i1 to i32
    %c1_i32_14 = arith.constant 1 : i32
    %c0_i32_15 = arith.constant 0 : i32
    %24 = arith.cmpi ne, %23, %c0_i32_15 : i32
    scf.if %24 {
      %c0_i32_157 = arith.constant 0 : i32
      %223 = tpu.memref_slice %arg2[%18, %c0_i32_157] : memref<128x128xf32, #tpu.memory_space<any>> -> memref<1x128xf32, #tpu.memory_space<any>>
      %c1_i32_158 = arith.constant 1 : i32
      %c0_i32_159 = arith.constant 0 : i32
      %224 = tpu.memref_slice %arg3[%c1_i32_158, %c0_i32_159] : memref<8x128xf32, #tpu.memory_space<vmem>> -> memref<1x128xf32, #tpu.memory_space<vmem>>
      %225 = tpu.memref_slice %arg5[%c1_i32_14] : memref<9x!tpu.dma_semaphore, #tpu.memory_space<semaphore_mem>> -> memref<1x!tpu.dma_semaphore, #tpu.memory_space<semaphore_mem>>
      %226 = tpu.memref_squeeze %225 : memref<1x!tpu.dma_semaphore, #tpu.memory_space<semaphore_mem>> -> memref<!tpu.dma_semaphore, #tpu.memory_space<semaphore_mem>>
      tpu.enqueue_dma source(%223 : memref<1x128xf32, #tpu.memory_space<any>>) target(%224 : memref<1x128xf32, #tpu.memory_space<vmem>>) target_semaphore(%226 : memref<!tpu.dma_semaphore, #tpu.memory_space<semaphore_mem>>)
    } else {
    }
    %c2_i32 = arith.constant 2 : i32
    %25 = arith.addi %0, %c2_i32 : i32
    %26 = arith.index_cast %25 : i32 to index
    %27 = memref.load %arg1[%26] : memref<16xi32, #tpu.memory_space<smem>>
    %c127_i32_16 = arith.constant 127 : i32
    %28 = arith.cmpi eq, %27, %c127_i32_16 : i32
    %29 = arith.extui %28 : i1 to i32
    %c2_i32_17 = arith.constant 2 : i32
    %c0_i32_18 = arith.constant 0 : i32
    %30 = arith.cmpi ne, %29, %c0_i32_18 : i32
    scf.if %30 {
      %c2_i32_157 = arith.constant 2 : i32
      %c0_i32_158 = arith.constant 0 : i32
      %223 = tpu.memref_slice %arg3[%c2_i32_157, %c0_i32_158] : memref<8x128xf32, #tpu.memory_space<vmem>> -> memref<1x128xf32, #tpu.memory_space<vmem>>
      %224 = tpu.memref_slice %arg5[%c2_i32_17] : memref<9x!tpu.dma_semaphore, #tpu.memory_space<semaphore_mem>> -> memref<1x!tpu.dma_semaphore, #tpu.memory_space<semaphore_mem>>
      %225 = tpu.memref_squeeze %224 : memref<1x!tpu.dma_semaphore, #tpu.memory_space<semaphore_mem>> -> memref<!tpu.dma_semaphore, #tpu.memory_space<semaphore_mem>>
      tpu.enqueue_dma source(%arg4 : memref<1x128xf32, #tpu.memory_space<vmem>>) target(%223 : memref<1x128xf32, #tpu.memory_space<vmem>>) target_semaphore(%225 : memref<!tpu.dma_semaphore, #tpu.memory_space<semaphore_mem>>)
    } else {
    }
    %true_19 = arith.constant true
    %31 = arith.xori %28, %true_19 : i1
    %32 = arith.extui %31 : i1 to i32
    %c2_i32_20 = arith.constant 2 : i32
    %c0_i32_21 = arith.constant 0 : i32
    %33 = arith.cmpi ne, %32, %c0_i32_21 : i32
    scf.if %33 {
      %c0_i32_157 = arith.constant 0 : i32
      %223 = tpu.memref_slice %arg2[%27, %c0_i32_157] : memref<128x128xf32, #tpu.memory_space<any>> -> memref<1x128xf32, #tpu.memory_space<any>>
      %c2_i32_158 = arith.constant 2 : i32
      %c0_i32_159 = arith.constant 0 : i32
      %224 = tpu.memref_slice %arg3[%c2_i32_158, %c0_i32_159] : memref<8x128xf32, #tpu.memory_space<vmem>> -> memref<1x128xf32, #tpu.memory_space<vmem>>
      %225 = tpu.memref_slice %arg5[%c2_i32_20] : memref<9x!tpu.dma_semaphore, #tpu.memory_space<semaphore_mem>> -> memref<1x!tpu.dma_semaphore, #tpu.memory_space<semaphore_mem>>
      %226 = tpu.memref_squeeze %225 : memref<1x!tpu.dma_semaphore, #tpu.memory_space<semaphore_mem>> -> memref<!tpu.dma_semaphore, #tpu.memory_space<semaphore_mem>>
      tpu.enqueue_dma source(%223 : memref<1x128xf32, #tpu.memory_space<any>>) target(%224 : memref<1x128xf32, #tpu.memory_space<vmem>>) target_semaphore(%226 : memref<!tpu.dma_semaphore, #tpu.memory_space<semaphore_mem>>)
    } else {
    }
    %c3_i32 = arith.constant 3 : i32
    %34 = arith.addi %0, %c3_i32 : i32
    %35 = arith.index_cast %34 : i32 to index
    %36 = memref.load %arg1[%35] : memref<16xi32, #tpu.memory_space<smem>>
    %c127_i32_22 = arith.constant 127 : i32
    %37 = arith.cmpi eq, %36, %c127_i32_22 : i32
    %38 = arith.extui %37 : i1 to i32
    %c3_i32_23 = arith.constant 3 : i32
    %c0_i32_24 = arith.constant 0 : i32
    %39 = arith.cmpi ne, %38, %c0_i32_24 : i32
    scf.if %39 {
      %c3_i32_157 = arith.constant 3 : i32
      %c0_i32_158 = arith.constant 0 : i32
      %223 = tpu.memref_slice %arg3[%c3_i32_157, %c0_i32_158] : memref<8x128xf32, #tpu.memory_space<vmem>> -> memref<1x128xf32, #tpu.memory_space<vmem>>
      %224 = tpu.memref_slice %arg5[%c3_i32_23] : memref<9x!tpu.dma_semaphore, #tpu.memory_space<semaphore_mem>> -> memref<1x!tpu.dma_semaphore, #tpu.memory_space<semaphore_mem>>
      %225 = tpu.memref_squeeze %224 : memref<1x!tpu.dma_semaphore, #tpu.memory_space<semaphore_mem>> -> memref<!tpu.dma_semaphore, #tpu.memory_space<semaphore_mem>>
      tpu.enqueue_dma source(%arg4 : memref<1x128xf32, #tpu.memory_space<vmem>>) target(%223 : memref<1x128xf32, #tpu.memory_space<vmem>>) target_semaphore(%225 : memref<!tpu.dma_semaphore, #tpu.memory_space<semaphore_mem>>)
    } else {
    }
    %true_25 = arith.constant true
    %40 = arith.xori %37, %true_25 : i1
    %41 = arith.extui %40 : i1 to i32
    %c3_i32_26 = arith.constant 3 : i32
    %c0_i32_27 = arith.constant 0 : i32
    %42 = arith.cmpi ne, %41, %c0_i32_27 : i32
    scf.if %42 {
      %c0_i32_157 = arith.constant 0 : i32
      %223 = tpu.memref_slice %arg2[%36, %c0_i32_157] : memref<128x128xf32, #tpu.memory_space<any>> -> memref<1x128xf32, #tpu.memory_space<any>>
      %c3_i32_158 = arith.constant 3 : i32
      %c0_i32_159 = arith.constant 0 : i32
      %224 = tpu.memref_slice %arg3[%c3_i32_158, %c0_i32_159] : memref<8x128xf32, #tpu.memory_space<vmem>> -> memref<1x128xf32, #tpu.memory_space<vmem>>
      %225 = tpu.memref_slice %arg5[%c3_i32_26] : memref<9x!tpu.dma_semaphore, #tpu.memory_space<semaphore_mem>> -> memref<1x!tpu.dma_semaphore, #tpu.memory_space<semaphore_mem>>
      %226 = tpu.memref_squeeze %225 : memref<1x!tpu.dma_semaphore, #tpu.memory_space<semaphore_mem>> -> memref<!tpu.dma_semaphore, #tpu.memory_space<semaphore_mem>>
      tpu.enqueue_dma source(%223 : memref<1x128xf32, #tpu.memory_space<any>>) target(%224 : memref<1x128xf32, #tpu.memory_space<vmem>>) target_semaphore(%226 : memref<!tpu.dma_semaphore, #tpu.memory_space<semaphore_mem>>)
    } else {
    }
    %c4_i32 = arith.constant 4 : i32
    %43 = arith.addi %0, %c4_i32 : i32
    %44 = arith.index_cast %43 : i32 to index
    %45 = memref.load %arg1[%44] : memref<16xi32, #tpu.memory_space<smem>>
    %c127_i32_28 = arith.constant 127 : i32
    %46 = arith.cmpi eq, %45, %c127_i32_28 : i32
    %47 = arith.extui %46 : i1 to i32
    %c4_i32_29 = arith.constant 4 : i32
    %c0_i32_30 = arith.constant 0 : i32
    %48 = arith.cmpi ne, %47, %c0_i32_30 : i32
    scf.if %48 {
      %c4_i32_157 = arith.constant 4 : i32
      %c0_i32_158 = arith.constant 0 : i32
      %223 = tpu.memref_slice %arg3[%c4_i32_157, %c0_i32_158] : memref<8x128xf32, #tpu.memory_space<vmem>> -> memref<1x128xf32, #tpu.memory_space<vmem>>
      %224 = tpu.memref_slice %arg5[%c4_i32_29] : memref<9x!tpu.dma_semaphore, #tpu.memory_space<semaphore_mem>> -> memref<1x!tpu.dma_semaphore, #tpu.memory_space<semaphore_mem>>
      %225 = tpu.memref_squeeze %224 : memref<1x!tpu.dma_semaphore, #tpu.memory_space<semaphore_mem>> -> memref<!tpu.dma_semaphore, #tpu.memory_space<semaphore_mem>>
      tpu.enqueue_dma source(%arg4 : memref<1x128xf32, #tpu.memory_space<vmem>>) target(%223 : memref<1x128xf32, #tpu.memory_space<vmem>>) target_semaphore(%225 : memref<!tpu.dma_semaphore, #tpu.memory_space<semaphore_mem>>)
    } else {
    }
    %true_31 = arith.constant true
    %49 = arith.xori %46, %true_31 : i1
    %50 = arith.extui %49 : i1 to i32
    %c4_i32_32 = arith.constant 4 : i32
    %c0_i32_33 = arith.constant 0 : i32
    %51 = arith.cmpi ne, %50, %c0_i32_33 : i32
    scf.if %51 {
      %c0_i32_157 = arith.constant 0 : i32
      %223 = tpu.memref_slice %arg2[%45, %c0_i32_157] : memref<128x128xf32, #tpu.memory_space<any>> -> memref<1x128xf32, #tpu.memory_space<any>>
      %c4_i32_158 = arith.constant 4 : i32
      %c0_i32_159 = arith.constant 0 : i32
      %224 = tpu.memref_slice %arg3[%c4_i32_158, %c0_i32_159] : memref<8x128xf32, #tpu.memory_space<vmem>> -> memref<1x128xf32, #tpu.memory_space<vmem>>
      %225 = tpu.memref_slice %arg5[%c4_i32_32] : memref<9x!tpu.dma_semaphore, #tpu.memory_space<semaphore_mem>> -> memref<1x!tpu.dma_semaphore, #tpu.memory_space<semaphore_mem>>
      %226 = tpu.memref_squeeze %225 : memref<1x!tpu.dma_semaphore, #tpu.memory_space<semaphore_mem>> -> memref<!tpu.dma_semaphore, #tpu.memory_space<semaphore_mem>>
      tpu.enqueue_dma source(%223 : memref<1x128xf32, #tpu.memory_space<any>>) target(%224 : memref<1x128xf32, #tpu.memory_space<vmem>>) target_semaphore(%226 : memref<!tpu.dma_semaphore, #tpu.memory_space<semaphore_mem>>)
    } else {
    }
    %c5_i32 = arith.constant 5 : i32
    %52 = arith.addi %0, %c5_i32 : i32
    %53 = arith.index_cast %52 : i32 to index
    %54 = memref.load %arg1[%53] : memref<16xi32, #tpu.memory_space<smem>>
    %c127_i32_34 = arith.constant 127 : i32
    %55 = arith.cmpi eq, %54, %c127_i32_34 : i32
    %56 = arith.extui %55 : i1 to i32
    %c5_i32_35 = arith.constant 5 : i32
    %c0_i32_36 = arith.constant 0 : i32
    %57 = arith.cmpi ne, %56, %c0_i32_36 : i32
    scf.if %57 {
      %c5_i32_157 = arith.constant 5 : i32
      %c0_i32_158 = arith.constant 0 : i32
      %223 = tpu.memref_slice %arg3[%c5_i32_157, %c0_i32_158] : memref<8x128xf32, #tpu.memory_space<vmem>> -> memref<1x128xf32, #tpu.memory_space<vmem>>
      %224 = tpu.memref_slice %arg5[%c5_i32_35] : memref<9x!tpu.dma_semaphore, #tpu.memory_space<semaphore_mem>> -> memref<1x!tpu.dma_semaphore, #tpu.memory_space<semaphore_mem>>
      %225 = tpu.memref_squeeze %224 : memref<1x!tpu.dma_semaphore, #tpu.memory_space<semaphore_mem>> -> memref<!tpu.dma_semaphore, #tpu.memory_space<semaphore_mem>>
      tpu.enqueue_dma source(%arg4 : memref<1x128xf32, #tpu.memory_space<vmem>>) target(%223 : memref<1x128xf32, #tpu.memory_space<vmem>>) target_semaphore(%225 : memref<!tpu.dma_semaphore, #tpu.memory_space<semaphore_mem>>)
    } else {
    }
    %true_37 = arith.constant true
    %58 = arith.xori %55, %true_37 : i1
    %59 = arith.extui %58 : i1 to i32
    %c5_i32_38 = arith.constant 5 : i32
    %c0_i32_39 = arith.constant 0 : i32
    %60 = arith.cmpi ne, %59, %c0_i32_39 : i32
    scf.if %60 {
      %c0_i32_157 = arith.constant 0 : i32
      %223 = tpu.memref_slice %arg2[%54, %c0_i32_157] : memref<128x128xf32, #tpu.memory_space<any>> -> memref<1x128xf32, #tpu.memory_space<any>>
      %c5_i32_158 = arith.constant 5 : i32
      %c0_i32_159 = arith.constant 0 : i32
      %224 = tpu.memref_slice %arg3[%c5_i32_158, %c0_i32_159] : memref<8x128xf32, #tpu.memory_space<vmem>> -> memref<1x128xf32, #tpu.memory_space<vmem>>
      %225 = tpu.memref_slice %arg5[%c5_i32_38] : memref<9x!tpu.dma_semaphore, #tpu.memory_space<semaphore_mem>> -> memref<1x!tpu.dma_semaphore, #tpu.memory_space<semaphore_mem>>
      %226 = tpu.memref_squeeze %225 : memref<1x!tpu.dma_semaphore, #tpu.memory_space<semaphore_mem>> -> memref<!tpu.dma_semaphore, #tpu.memory_space<semaphore_mem>>
      tpu.enqueue_dma source(%223 : memref<1x128xf32, #tpu.memory_space<any>>) target(%224 : memref<1x128xf32, #tpu.memory_space<vmem>>) target_semaphore(%226 : memref<!tpu.dma_semaphore, #tpu.memory_space<semaphore_mem>>)
    } else {
    }
    %c6_i32 = arith.constant 6 : i32
    %61 = arith.addi %0, %c6_i32 : i32
    %62 = arith.index_cast %61 : i32 to index
    %63 = memref.load %arg1[%62] : memref<16xi32, #tpu.memory_space<smem>>
    %c127_i32_40 = arith.constant 127 : i32
    %64 = arith.cmpi eq, %63, %c127_i32_40 : i32
    %65 = arith.extui %64 : i1 to i32
    %c6_i32_41 = arith.constant 6 : i32
    %c0_i32_42 = arith.constant 0 : i32
    %66 = arith.cmpi ne, %65, %c0_i32_42 : i32
    scf.if %66 {
      %c6_i32_157 = arith.constant 6 : i32
      %c0_i32_158 = arith.constant 0 : i32
      %223 = tpu.memref_slice %arg3[%c6_i32_157, %c0_i32_158] : memref<8x128xf32, #tpu.memory_space<vmem>> -> memref<1x128xf32, #tpu.memory_space<vmem>>
      %224 = tpu.memref_slice %arg5[%c6_i32_41] : memref<9x!tpu.dma_semaphore, #tpu.memory_space<semaphore_mem>> -> memref<1x!tpu.dma_semaphore, #tpu.memory_space<semaphore_mem>>
      %225 = tpu.memref_squeeze %224 : memref<1x!tpu.dma_semaphore, #tpu.memory_space<semaphore_mem>> -> memref<!tpu.dma_semaphore, #tpu.memory_space<semaphore_mem>>
      tpu.enqueue_dma source(%arg4 : memref<1x128xf32, #tpu.memory_space<vmem>>) target(%223 : memref<1x128xf32, #tpu.memory_space<vmem>>) target_semaphore(%225 : memref<!tpu.dma_semaphore, #tpu.memory_space<semaphore_mem>>)
    } else {
    }
    %true_43 = arith.constant true
    %67 = arith.xori %64, %true_43 : i1
    %68 = arith.extui %67 : i1 to i32
    %c6_i32_44 = arith.constant 6 : i32
    %c0_i32_45 = arith.constant 0 : i32
    %69 = arith.cmpi ne, %68, %c0_i32_45 : i32
    scf.if %69 {
      %c0_i32_157 = arith.constant 0 : i32
      %223 = tpu.memref_slice %arg2[%63, %c0_i32_157] : memref<128x128xf32, #tpu.memory_space<any>> -> memref<1x128xf32, #tpu.memory_space<any>>
      %c6_i32_158 = arith.constant 6 : i32
      %c0_i32_159 = arith.constant 0 : i32
      %224 = tpu.memref_slice %arg3[%c6_i32_158, %c0_i32_159] : memref<8x128xf32, #tpu.memory_space<vmem>> -> memref<1x128xf32, #tpu.memory_space<vmem>>
      %225 = tpu.memref_slice %arg5[%c6_i32_44] : memref<9x!tpu.dma_semaphore, #tpu.memory_space<semaphore_mem>> -> memref<1x!tpu.dma_semaphore, #tpu.memory_space<semaphore_mem>>
      %226 = tpu.memref_squeeze %225 : memref<1x!tpu.dma_semaphore, #tpu.memory_space<semaphore_mem>> -> memref<!tpu.dma_semaphore, #tpu.memory_space<semaphore_mem>>
      tpu.enqueue_dma source(%223 : memref<1x128xf32, #tpu.memory_space<any>>) target(%224 : memref<1x128xf32, #tpu.memory_space<vmem>>) target_semaphore(%226 : memref<!tpu.dma_semaphore, #tpu.memory_space<semaphore_mem>>)
    } else {
    }
    %c7_i32 = arith.constant 7 : i32
    %70 = arith.addi %0, %c7_i32 : i32
    %71 = arith.index_cast %70 : i32 to index
    %72 = memref.load %arg1[%71] : memref<16xi32, #tpu.memory_space<smem>>
    %c127_i32_46 = arith.constant 127 : i32
    %73 = arith.cmpi eq, %72, %c127_i32_46 : i32
    %74 = arith.extui %73 : i1 to i32
    %c7_i32_47 = arith.constant 7 : i32
    %c0_i32_48 = arith.constant 0 : i32
    %75 = arith.cmpi ne, %74, %c0_i32_48 : i32
    scf.if %75 {
      %c7_i32_157 = arith.constant 7 : i32
      %c0_i32_158 = arith.constant 0 : i32
      %223 = tpu.memref_slice %arg3[%c7_i32_157, %c0_i32_158] : memref<8x128xf32, #tpu.memory_space<vmem>> -> memref<1x128xf32, #tpu.memory_space<vmem>>
      %224 = tpu.memref_slice %arg5[%c7_i32_47] : memref<9x!tpu.dma_semaphore, #tpu.memory_space<semaphore_mem>> -> memref<1x!tpu.dma_semaphore, #tpu.memory_space<semaphore_mem>>
      %225 = tpu.memref_squeeze %224 : memref<1x!tpu.dma_semaphore, #tpu.memory_space<semaphore_mem>> -> memref<!tpu.dma_semaphore, #tpu.memory_space<semaphore_mem>>
      tpu.enqueue_dma source(%arg4 : memref<1x128xf32, #tpu.memory_space<vmem>>) target(%223 : memref<1x128xf32, #tpu.memory_space<vmem>>) target_semaphore(%225 : memref<!tpu.dma_semaphore, #tpu.memory_space<semaphore_mem>>)
    } else {
    }
    %true_49 = arith.constant true
    %76 = arith.xori %73, %true_49 : i1
    %77 = arith.extui %76 : i1 to i32
    %c7_i32_50 = arith.constant 7 : i32
    %c0_i32_51 = arith.constant 0 : i32
    %78 = arith.cmpi ne, %77, %c0_i32_51 : i32
    scf.if %78 {
      %c0_i32_157 = arith.constant 0 : i32
      %223 = tpu.memref_slice %arg2[%72, %c0_i32_157] : memref<128x128xf32, #tpu.memory_space<any>> -> memref<1x128xf32, #tpu.memory_space<any>>
      %c7_i32_158 = arith.constant 7 : i32
      %c0_i32_159 = arith.constant 0 : i32
      %224 = tpu.memref_slice %arg3[%c7_i32_158, %c0_i32_159] : memref<8x128xf32, #tpu.memory_space<vmem>> -> memref<1x128xf32, #tpu.memory_space<vmem>>
      %225 = tpu.memref_slice %arg5[%c7_i32_50] : memref<9x!tpu.dma_semaphore, #tpu.memory_space<semaphore_mem>> -> memref<1x!tpu.dma_semaphore, #tpu.memory_space<semaphore_mem>>
      %226 = tpu.memref_squeeze %225 : memref<1x!tpu.dma_semaphore, #tpu.memory_space<semaphore_mem>> -> memref<!tpu.dma_semaphore, #tpu.memory_space<semaphore_mem>>
      tpu.enqueue_dma source(%223 : memref<1x128xf32, #tpu.memory_space<any>>) target(%224 : memref<1x128xf32, #tpu.memory_space<vmem>>) target_semaphore(%226 : memref<!tpu.dma_semaphore, #tpu.memory_space<semaphore_mem>>)
    } else {
    }
    %c0_i32_52 = arith.constant 0 : i32
    %c8_i32_53 = arith.constant 8 : i32
    %79 = arith.addi %c0_i32_52, %c8_i32_53 : i32
    %c8_i32_54 = arith.constant 8 : i32
    %80 = arith.cmpi slt, %79, %c8_i32_54 : i32
    %81 = arith.extui %80 : i1 to i32
    %c0_i32_55 = arith.constant 0 : i32
    %82 = arith.cmpi ne, %81, %c0_i32_55 : i32
    scf.if %82 {
      %c8_i32_157 = arith.constant 8 : i32
      %223 = arith.addi %c0_i32_52, %c8_i32_157 : i32
      %224 = arith.addi %0, %223 : i32
      %225 = arith.index_cast %224 : i32 to index
      %226 = memref.load %arg1[%225] : memref<16xi32, #tpu.memory_space<smem>>
      %c8_i32_158 = arith.constant 8 : i32
      %c0_i32_159 = arith.constant 0 : i32
      %227 = arith.cmpi eq, %c8_i32_158, %c0_i32_159 : i32
      %c1_i32_160 = arith.constant 1 : i32
      %228 = arith.select %227, %c1_i32_160, %c8_i32_158 : i32
      %229 = arith.remsi %223, %228 : i32
      %c0_i32_161 = arith.constant 0 : i32
      %230 = arith.cmpi ne, %229, %c0_i32_161 : i32
      %c0_i32_162 = arith.constant 0 : i32
      %231 = arith.cmpi slt, %229, %c0_i32_162 : i32
      %c0_i32_163 = arith.constant 0 : i32
      %232 = arith.cmpi slt, %228, %c0_i32_163 : i32
      %233 = arith.xori %231, %232 : i1
      %234 = arith.andi %233, %230 : i1
      %235 = arith.addi %229, %228 : i32
      %236 = arith.select %234, %235, %229 : i32
      %c127_i32_164 = arith.constant 127 : i32
      %237 = arith.cmpi eq, %226, %c127_i32_164 : i32
      %238 = arith.extui %237 : i1 to i32
      %c0_i32_165 = arith.constant 0 : i32
      %239 = arith.cmpi ne, %238, %c0_i32_165 : i32
      scf.if %239 {
        %c0_i32_168 = arith.constant 0 : i32
        %243 = tpu.memref_slice %arg3[%223, %c0_i32_168] : memref<8x128xf32, #tpu.memory_space<vmem>> -> memref<1x128xf32, #tpu.memory_space<vmem>>
        %244 = tpu.memref_slice %arg5[%236] : memref<9x!tpu.dma_semaphore, #tpu.memory_space<semaphore_mem>> -> memref<1x!tpu.dma_semaphore, #tpu.memory_space<semaphore_mem>>
        %245 = tpu.memref_squeeze %244 : memref<1x!tpu.dma_semaphore, #tpu.memory_space<semaphore_mem>> -> memref<!tpu.dma_semaphore, #tpu.memory_space<semaphore_mem>>
        tpu.enqueue_dma source(%arg4 : memref<1x128xf32, #tpu.memory_space<vmem>>) target(%243 : memref<1x128xf32, #tpu.memory_space<vmem>>) target_semaphore(%245 : memref<!tpu.dma_semaphore, #tpu.memory_space<semaphore_mem>>)
      } else {
      }
      %true_166 = arith.constant true
      %240 = arith.xori %237, %true_166 : i1
      %241 = arith.extui %240 : i1 to i32
      %c0_i32_167 = arith.constant 0 : i32
      %242 = arith.cmpi ne, %241, %c0_i32_167 : i32
      scf.if %242 {
        %c0_i32_168 = arith.constant 0 : i32
        %243 = tpu.memref_slice %arg2[%226, %c0_i32_168] : memref<128x128xf32, #tpu.memory_space<any>> -> memref<1x128xf32, #tpu.memory_space<any>>
        %c0_i32_169 = arith.constant 0 : i32
        %244 = tpu.memref_slice %arg3[%223, %c0_i32_169] : memref<8x128xf32, #tpu.memory_space<vmem>> -> memref<1x128xf32, #tpu.memory_space<vmem>>
        %245 = tpu.memref_slice %arg5[%236] : memref<9x!tpu.dma_semaphore, #tpu.memory_space<semaphore_mem>> -> memref<1x!tpu.dma_semaphore, #tpu.memory_space<semaphore_mem>>
        %246 = tpu.memref_squeeze %245 : memref<1x!tpu.dma_semaphore, #tpu.memory_space<semaphore_mem>> -> memref<!tpu.dma_semaphore, #tpu.memory_space<semaphore_mem>>
        tpu.enqueue_dma source(%243 : memref<1x128xf32, #tpu.memory_space<any>>) target(%244 : memref<1x128xf32, #tpu.memory_space<vmem>>) target_semaphore(%246 : memref<!tpu.dma_semaphore, #tpu.memory_space<semaphore_mem>>)
      } else {
      }
    } else {
    }
    %c8_i32_56 = arith.constant 8 : i32
    %c0_i32_57 = arith.constant 0 : i32
    %83 = arith.cmpi eq, %c8_i32_56, %c0_i32_57 : i32
    %c1_i32_58 = arith.constant 1 : i32
    %84 = arith.select %83, %c1_i32_58, %c8_i32_56 : i32
    %85 = arith.remsi %c0_i32_52, %84 : i32
    %c0_i32_59 = arith.constant 0 : i32
    %86 = arith.cmpi ne, %85, %c0_i32_59 : i32
    %c0_i32_60 = arith.constant 0 : i32
    %87 = arith.cmpi slt, %85, %c0_i32_60 : i32
    %c0_i32_61 = arith.constant 0 : i32
    %88 = arith.cmpi slt, %84, %c0_i32_61 : i32
    %89 = arith.xori %87, %88 : i1
    %90 = arith.andi %89, %86 : i1
    %91 = arith.addi %85, %84 : i32
    %92 = arith.select %90, %91, %85 : i32
    %c0_i32_62 = arith.constant 0 : i32
    %c0_i32_63 = arith.constant 0 : i32
    %93 = tpu.memref_slice %arg2[%c0_i32_62, %c0_i32_63] : memref<128x128xf32, #tpu.memory_space<any>> -> memref<1x128xf32, #tpu.memory_space<any>>
    %c0_i32_64 = arith.constant 0 : i32
    %94 = tpu.memref_slice %arg3[%c0_i32_52, %c0_i32_64] : memref<8x128xf32, #tpu.memory_space<vmem>> -> memref<1x128xf32, #tpu.memory_space<vmem>>
    %95 = tpu.memref_slice %arg5[%92] : memref<9x!tpu.dma_semaphore, #tpu.memory_space<semaphore_mem>> -> memref<1x!tpu.dma_semaphore, #tpu.memory_space<semaphore_mem>>
    %96 = tpu.memref_squeeze %95 : memref<1x!tpu.dma_semaphore, #tpu.memory_space<semaphore_mem>> -> memref<!tpu.dma_semaphore, #tpu.memory_space<semaphore_mem>>
    tpu.wait_dma2 semaphore(%96 : memref<!tpu.dma_semaphore, #tpu.memory_space<semaphore_mem>>) src(%93 : memref<1x128xf32, #tpu.memory_space<any>>) dst(%94 : memref<1x128xf32, #tpu.memory_space<vmem>>)
    %c1_i32_65 = arith.constant 1 : i32
    %c8_i32_66 = arith.constant 8 : i32
    %97 = arith.addi %c1_i32_65, %c8_i32_66 : i32
    %c8_i32_67 = arith.constant 8 : i32
    %98 = arith.cmpi slt, %97, %c8_i32_67 : i32
    %99 = arith.extui %98 : i1 to i32
    %c0_i32_68 = arith.constant 0 : i32
    %100 = arith.cmpi ne, %99, %c0_i32_68 : i32
    scf.if %100 {
      %c8_i32_157 = arith.constant 8 : i32
      %223 = arith.addi %c1_i32_65, %c8_i32_157 : i32
      %224 = arith.addi %0, %223 : i32
      %225 = arith.index_cast %224 : i32 to index
      %226 = memref.load %arg1[%225] : memref<16xi32, #tpu.memory_space<smem>>
      %c8_i32_158 = arith.constant 8 : i32
      %c0_i32_159 = arith.constant 0 : i32
      %227 = arith.cmpi eq, %c8_i32_158, %c0_i32_159 : i32
      %c1_i32_160 = arith.constant 1 : i32
      %228 = arith.select %227, %c1_i32_160, %c8_i32_158 : i32
      %229 = arith.remsi %223, %228 : i32
      %c0_i32_161 = arith.constant 0 : i32
      %230 = arith.cmpi ne, %229, %c0_i32_161 : i32
      %c0_i32_162 = arith.constant 0 : i32
      %231 = arith.cmpi slt, %229, %c0_i32_162 : i32
      %c0_i32_163 = arith.constant 0 : i32
      %232 = arith.cmpi slt, %228, %c0_i32_163 : i32
      %233 = arith.xori %231, %232 : i1
      %234 = arith.andi %233, %230 : i1
      %235 = arith.addi %229, %228 : i32
      %236 = arith.select %234, %235, %229 : i32
      %c127_i32_164 = arith.constant 127 : i32
      %237 = arith.cmpi eq, %226, %c127_i32_164 : i32
      %238 = arith.extui %237 : i1 to i32
      %c0_i32_165 = arith.constant 0 : i32
      %239 = arith.cmpi ne, %238, %c0_i32_165 : i32
      scf.if %239 {
        %c0_i32_168 = arith.constant 0 : i32
        %243 = tpu.memref_slice %arg3[%223, %c0_i32_168] : memref<8x128xf32, #tpu.memory_space<vmem>> -> memref<1x128xf32, #tpu.memory_space<vmem>>
        %244 = tpu.memref_slice %arg5[%236] : memref<9x!tpu.dma_semaphore, #tpu.memory_space<semaphore_mem>> -> memref<1x!tpu.dma_semaphore, #tpu.memory_space<semaphore_mem>>
        %245 = tpu.memref_squeeze %244 : memref<1x!tpu.dma_semaphore, #tpu.memory_space<semaphore_mem>> -> memref<!tpu.dma_semaphore, #tpu.memory_space<semaphore_mem>>
        tpu.enqueue_dma source(%arg4 : memref<1x128xf32, #tpu.memory_space<vmem>>) target(%243 : memref<1x128xf32, #tpu.memory_space<vmem>>) target_semaphore(%245 : memref<!tpu.dma_semaphore, #tpu.memory_space<semaphore_mem>>)
      } else {
      }
      %true_166 = arith.constant true
      %240 = arith.xori %237, %true_166 : i1
      %241 = arith.extui %240 : i1 to i32
      %c0_i32_167 = arith.constant 0 : i32
      %242 = arith.cmpi ne, %241, %c0_i32_167 : i32
      scf.if %242 {
        %c0_i32_168 = arith.constant 0 : i32
        %243 = tpu.memref_slice %arg2[%226, %c0_i32_168] : memref<128x128xf32, #tpu.memory_space<any>> -> memref<1x128xf32, #tpu.memory_space<any>>
        %c0_i32_169 = arith.constant 0 : i32
        %244 = tpu.memref_slice %arg3[%223, %c0_i32_169] : memref<8x128xf32, #tpu.memory_space<vmem>> -> memref<1x128xf32, #tpu.memory_space<vmem>>
        %245 = tpu.memref_slice %arg5[%236] : memref<9x!tpu.dma_semaphore, #tpu.memory_space<semaphore_mem>> -> memref<1x!tpu.dma_semaphore, #tpu.memory_space<semaphore_mem>>
        %246 = tpu.memref_squeeze %245 : memref<1x!tpu.dma_semaphore, #tpu.memory_space<semaphore_mem>> -> memref<!tpu.dma_semaphore, #tpu.memory_space<semaphore_mem>>
        tpu.enqueue_dma source(%243 : memref<1x128xf32, #tpu.memory_space<any>>) target(%244 : memref<1x128xf32, #tpu.memory_space<vmem>>) target_semaphore(%246 : memref<!tpu.dma_semaphore, #tpu.memory_space<semaphore_mem>>)
      } else {
      }
    } else {
    }
    %c8_i32_69 = arith.constant 8 : i32
    %c0_i32_70 = arith.constant 0 : i32
    %101 = arith.cmpi eq, %c8_i32_69, %c0_i32_70 : i32
    %c1_i32_71 = arith.constant 1 : i32
    %102 = arith.select %101, %c1_i32_71, %c8_i32_69 : i32
    %103 = arith.remsi %c1_i32_65, %102 : i32
    %c0_i32_72 = arith.constant 0 : i32
    %104 = arith.cmpi ne, %103, %c0_i32_72 : i32
    %c0_i32_73 = arith.constant 0 : i32
    %105 = arith.cmpi slt, %103, %c0_i32_73 : i32
    %c0_i32_74 = arith.constant 0 : i32
    %106 = arith.cmpi slt, %102, %c0_i32_74 : i32
    %107 = arith.xori %105, %106 : i1
    %108 = arith.andi %107, %104 : i1
    %109 = arith.addi %103, %102 : i32
    %110 = arith.select %108, %109, %103 : i32
    %c0_i32_75 = arith.constant 0 : i32
    %c0_i32_76 = arith.constant 0 : i32
    %111 = tpu.memref_slice %arg2[%c0_i32_75, %c0_i32_76] : memref<128x128xf32, #tpu.memory_space<any>> -> memref<1x128xf32, #tpu.memory_space<any>>
    %c0_i32_77 = arith.constant 0 : i32
    %112 = tpu.memref_slice %arg3[%c1_i32_65, %c0_i32_77] : memref<8x128xf32, #tpu.memory_space<vmem>> -> memref<1x128xf32, #tpu.memory_space<vmem>>
    %113 = tpu.memref_slice %arg5[%110] : memref<9x!tpu.dma_semaphore, #tpu.memory_space<semaphore_mem>> -> memref<1x!tpu.dma_semaphore, #tpu.memory_space<semaphore_mem>>
    %114 = tpu.memref_squeeze %113 : memref<1x!tpu.dma_semaphore, #tpu.memory_space<semaphore_mem>> -> memref<!tpu.dma_semaphore, #tpu.memory_space<semaphore_mem>>
    tpu.wait_dma2 semaphore(%114 : memref<!tpu.dma_semaphore, #tpu.memory_space<semaphore_mem>>) src(%111 : memref<1x128xf32, #tpu.memory_space<any>>) dst(%112 : memref<1x128xf32, #tpu.memory_space<vmem>>)
    %c2_i32_78 = arith.constant 2 : i32
    %c8_i32_79 = arith.constant 8 : i32
    %115 = arith.addi %c2_i32_78, %c8_i32_79 : i32
    %c8_i32_80 = arith.constant 8 : i32
    %116 = arith.cmpi slt, %115, %c8_i32_80 : i32
    %117 = arith.extui %116 : i1 to i32
    %c0_i32_81 = arith.constant 0 : i32
    %118 = arith.cmpi ne, %117, %c0_i32_81 : i32
    scf.if %118 {
      %c8_i32_157 = arith.constant 8 : i32
      %223 = arith.addi %c2_i32_78, %c8_i32_157 : i32
      %224 = arith.addi %0, %223 : i32
      %225 = arith.index_cast %224 : i32 to index
      %226 = memref.load %arg1[%225] : memref<16xi32, #tpu.memory_space<smem>>
      %c8_i32_158 = arith.constant 8 : i32
      %c0_i32_159 = arith.constant 0 : i32
      %227 = arith.cmpi eq, %c8_i32_158, %c0_i32_159 : i32
      %c1_i32_160 = arith.constant 1 : i32
      %228 = arith.select %227, %c1_i32_160, %c8_i32_158 : i32
      %229 = arith.remsi %223, %228 : i32
      %c0_i32_161 = arith.constant 0 : i32
      %230 = arith.cmpi ne, %229, %c0_i32_161 : i32
      %c0_i32_162 = arith.constant 0 : i32
      %231 = arith.cmpi slt, %229, %c0_i32_162 : i32
      %c0_i32_163 = arith.constant 0 : i32
      %232 = arith.cmpi slt, %228, %c0_i32_163 : i32
      %233 = arith.xori %231, %232 : i1
      %234 = arith.andi %233, %230 : i1
      %235 = arith.addi %229, %228 : i32
      %236 = arith.select %234, %235, %229 : i32
      %c127_i32_164 = arith.constant 127 : i32
      %237 = arith.cmpi eq, %226, %c127_i32_164 : i32
      %238 = arith.extui %237 : i1 to i32
      %c0_i32_165 = arith.constant 0 : i32
      %239 = arith.cmpi ne, %238, %c0_i32_165 : i32
      scf.if %239 {
        %c0_i32_168 = arith.constant 0 : i32
        %243 = tpu.memref_slice %arg3[%223, %c0_i32_168] : memref<8x128xf32, #tpu.memory_space<vmem>> -> memref<1x128xf32, #tpu.memory_space<vmem>>
        %244 = tpu.memref_slice %arg5[%236] : memref<9x!tpu.dma_semaphore, #tpu.memory_space<semaphore_mem>> -> memref<1x!tpu.dma_semaphore, #tpu.memory_space<semaphore_mem>>
        %245 = tpu.memref_squeeze %244 : memref<1x!tpu.dma_semaphore, #tpu.memory_space<semaphore_mem>> -> memref<!tpu.dma_semaphore, #tpu.memory_space<semaphore_mem>>
        tpu.enqueue_dma source(%arg4 : memref<1x128xf32, #tpu.memory_space<vmem>>) target(%243 : memref<1x128xf32, #tpu.memory_space<vmem>>) target_semaphore(%245 : memref<!tpu.dma_semaphore, #tpu.memory_space<semaphore_mem>>)
      } else {
      }
      %true_166 = arith.constant true
      %240 = arith.xori %237, %true_166 : i1
      %241 = arith.extui %240 : i1 to i32
      %c0_i32_167 = arith.constant 0 : i32
      %242 = arith.cmpi ne, %241, %c0_i32_167 : i32
      scf.if %242 {
        %c0_i32_168 = arith.constant 0 : i32
        %243 = tpu.memref_slice %arg2[%226, %c0_i32_168] : memref<128x128xf32, #tpu.memory_space<any>> -> memref<1x128xf32, #tpu.memory_space<any>>
        %c0_i32_169 = arith.constant 0 : i32
        %244 = tpu.memref_slice %arg3[%223, %c0_i32_169] : memref<8x128xf32, #tpu.memory_space<vmem>> -> memref<1x128xf32, #tpu.memory_space<vmem>>
        %245 = tpu.memref_slice %arg5[%236] : memref<9x!tpu.dma_semaphore, #tpu.memory_space<semaphore_mem>> -> memref<1x!tpu.dma_semaphore, #tpu.memory_space<semaphore_mem>>
        %246 = tpu.memref_squeeze %245 : memref<1x!tpu.dma_semaphore, #tpu.memory_space<semaphore_mem>> -> memref<!tpu.dma_semaphore, #tpu.memory_space<semaphore_mem>>
        tpu.enqueue_dma source(%243 : memref<1x128xf32, #tpu.memory_space<any>>) target(%244 : memref<1x128xf32, #tpu.memory_space<vmem>>) target_semaphore(%246 : memref<!tpu.dma_semaphore, #tpu.memory_space<semaphore_mem>>)
      } else {
      }
    } else {
    }
    %c8_i32_82 = arith.constant 8 : i32
    %c0_i32_83 = arith.constant 0 : i32
    %119 = arith.cmpi eq, %c8_i32_82, %c0_i32_83 : i32
    %c1_i32_84 = arith.constant 1 : i32
    %120 = arith.select %119, %c1_i32_84, %c8_i32_82 : i32
    %121 = arith.remsi %c2_i32_78, %120 : i32
    %c0_i32_85 = arith.constant 0 : i32
    %122 = arith.cmpi ne, %121, %c0_i32_85 : i32
    %c0_i32_86 = arith.constant 0 : i32
    %123 = arith.cmpi slt, %121, %c0_i32_86 : i32
    %c0_i32_87 = arith.constant 0 : i32
    %124 = arith.cmpi slt, %120, %c0_i32_87 : i32
    %125 = arith.xori %123, %124 : i1
    %126 = arith.andi %125, %122 : i1
    %127 = arith.addi %121, %120 : i32
    %128 = arith.select %126, %127, %121 : i32
    %c0_i32_88 = arith.constant 0 : i32
    %c0_i32_89 = arith.constant 0 : i32
    %129 = tpu.memref_slice %arg2[%c0_i32_88, %c0_i32_89] : memref<128x128xf32, #tpu.memory_space<any>> -> memref<1x128xf32, #tpu.memory_space<any>>
    %c0_i32_90 = arith.constant 0 : i32
    %130 = tpu.memref_slice %arg3[%c2_i32_78, %c0_i32_90] : memref<8x128xf32, #tpu.memory_space<vmem>> -> memref<1x128xf32, #tpu.memory_space<vmem>>
    %131 = tpu.memref_slice %arg5[%128] : memref<9x!tpu.dma_semaphore, #tpu.memory_space<semaphore_mem>> -> memref<1x!tpu.dma_semaphore, #tpu.memory_space<semaphore_mem>>
    %132 = tpu.memref_squeeze %131 : memref<1x!tpu.dma_semaphore, #tpu.memory_space<semaphore_mem>> -> memref<!tpu.dma_semaphore, #tpu.memory_space<semaphore_mem>>
    tpu.wait_dma2 semaphore(%132 : memref<!tpu.dma_semaphore, #tpu.memory_space<semaphore_mem>>) src(%129 : memref<1x128xf32, #tpu.memory_space<any>>) dst(%130 : memref<1x128xf32, #tpu.memory_space<vmem>>)
    %c3_i32_91 = arith.constant 3 : i32
    %c8_i32_92 = arith.constant 8 : i32
    %133 = arith.addi %c3_i32_91, %c8_i32_92 : i32
    %c8_i32_93 = arith.constant 8 : i32
    %134 = arith.cmpi slt, %133, %c8_i32_93 : i32
    %135 = arith.extui %134 : i1 to i32
    %c0_i32_94 = arith.constant 0 : i32
    %136 = arith.cmpi ne, %135, %c0_i32_94 : i32
    scf.if %136 {
      %c8_i32_157 = arith.constant 8 : i32
      %223 = arith.addi %c3_i32_91, %c8_i32_157 : i32
      %224 = arith.addi %0, %223 : i32
      %225 = arith.index_cast %224 : i32 to index
      %226 = memref.load %arg1[%225] : memref<16xi32, #tpu.memory_space<smem>>
      %c8_i32_158 = arith.constant 8 : i32
      %c0_i32_159 = arith.constant 0 : i32
      %227 = arith.cmpi eq, %c8_i32_158, %c0_i32_159 : i32
      %c1_i32_160 = arith.constant 1 : i32
      %228 = arith.select %227, %c1_i32_160, %c8_i32_158 : i32
      %229 = arith.remsi %223, %228 : i32
      %c0_i32_161 = arith.constant 0 : i32
      %230 = arith.cmpi ne, %229, %c0_i32_161 : i32
      %c0_i32_162 = arith.constant 0 : i32
      %231 = arith.cmpi slt, %229, %c0_i32_162 : i32
      %c0_i32_163 = arith.constant 0 : i32
      %232 = arith.cmpi slt, %228, %c0_i32_163 : i32
      %233 = arith.xori %231, %232 : i1
      %234 = arith.andi %233, %230 : i1
      %235 = arith.addi %229, %228 : i32
      %236 = arith.select %234, %235, %229 : i32
      %c127_i32_164 = arith.constant 127 : i32
      %237 = arith.cmpi eq, %226, %c127_i32_164 : i32
      %238 = arith.extui %237 : i1 to i32
      %c0_i32_165 = arith.constant 0 : i32
      %239 = arith.cmpi ne, %238, %c0_i32_165 : i32
      scf.if %239 {
        %c0_i32_168 = arith.constant 0 : i32
        %243 = tpu.memref_slice %arg3[%223, %c0_i32_168] : memref<8x128xf32, #tpu.memory_space<vmem>> -> memref<1x128xf32, #tpu.memory_space<vmem>>
        %244 = tpu.memref_slice %arg5[%236] : memref<9x!tpu.dma_semaphore, #tpu.memory_space<semaphore_mem>> -> memref<1x!tpu.dma_semaphore, #tpu.memory_space<semaphore_mem>>
        %245 = tpu.memref_squeeze %244 : memref<1x!tpu.dma_semaphore, #tpu.memory_space<semaphore_mem>> -> memref<!tpu.dma_semaphore, #tpu.memory_space<semaphore_mem>>
        tpu.enqueue_dma source(%arg4 : memref<1x128xf32, #tpu.memory_space<vmem>>) target(%243 : memref<1x128xf32, #tpu.memory_space<vmem>>) target_semaphore(%245 : memref<!tpu.dma_semaphore, #tpu.memory_space<semaphore_mem>>)
      } else {
      }
      %true_166 = arith.constant true
      %240 = arith.xori %237, %true_166 : i1
      %241 = arith.extui %240 : i1 to i32
      %c0_i32_167 = arith.constant 0 : i32
      %242 = arith.cmpi ne, %241, %c0_i32_167 : i32
      scf.if %242 {
        %c0_i32_168 = arith.constant 0 : i32
        %243 = tpu.memref_slice %arg2[%226, %c0_i32_168] : memref<128x128xf32, #tpu.memory_space<any>> -> memref<1x128xf32, #tpu.memory_space<any>>
        %c0_i32_169 = arith.constant 0 : i32
        %244 = tpu.memref_slice %arg3[%223, %c0_i32_169] : memref<8x128xf32, #tpu.memory_space<vmem>> -> memref<1x128xf32, #tpu.memory_space<vmem>>
        %245 = tpu.memref_slice %arg5[%236] : memref<9x!tpu.dma_semaphore, #tpu.memory_space<semaphore_mem>> -> memref<1x!tpu.dma_semaphore, #tpu.memory_space<semaphore_mem>>
        %246 = tpu.memref_squeeze %245 : memref<1x!tpu.dma_semaphore, #tpu.memory_space<semaphore_mem>> -> memref<!tpu.dma_semaphore, #tpu.memory_space<semaphore_mem>>
        tpu.enqueue_dma source(%243 : memref<1x128xf32, #tpu.memory_space<any>>) target(%244 : memref<1x128xf32, #tpu.memory_space<vmem>>) target_semaphore(%246 : memref<!tpu.dma_semaphore, #tpu.memory_space<semaphore_mem>>)
      } else {
      }
    } else {
    }
    %c8_i32_95 = arith.constant 8 : i32
    %c0_i32_96 = arith.constant 0 : i32
    %137 = arith.cmpi eq, %c8_i32_95, %c0_i32_96 : i32
    %c1_i32_97 = arith.constant 1 : i32
    %138 = arith.select %137, %c1_i32_97, %c8_i32_95 : i32
    %139 = arith.remsi %c3_i32_91, %138 : i32
    %c0_i32_98 = arith.constant 0 : i32
    %140 = arith.cmpi ne, %139, %c0_i32_98 : i32
    %c0_i32_99 = arith.constant 0 : i32
    %141 = arith.cmpi slt, %139, %c0_i32_99 : i32
    %c0_i32_100 = arith.constant 0 : i32
    %142 = arith.cmpi slt, %138, %c0_i32_100 : i32
    %143 = arith.xori %141, %142 : i1
    %144 = arith.andi %143, %140 : i1
    %145 = arith.addi %139, %138 : i32
    %146 = arith.select %144, %145, %139 : i32
    %c0_i32_101 = arith.constant 0 : i32
    %c0_i32_102 = arith.constant 0 : i32
    %147 = tpu.memref_slice %arg2[%c0_i32_101, %c0_i32_102] : memref<128x128xf32, #tpu.memory_space<any>> -> memref<1x128xf32, #tpu.memory_space<any>>
    %c0_i32_103 = arith.constant 0 : i32
    %148 = tpu.memref_slice %arg3[%c3_i32_91, %c0_i32_103] : memref<8x128xf32, #tpu.memory_space<vmem>> -> memref<1x128xf32, #tpu.memory_space<vmem>>
    %149 = tpu.memref_slice %arg5[%146] : memref<9x!tpu.dma_semaphore, #tpu.memory_space<semaphore_mem>> -> memref<1x!tpu.dma_semaphore, #tpu.memory_space<semaphore_mem>>
    %150 = tpu.memref_squeeze %149 : memref<1x!tpu.dma_semaphore, #tpu.memory_space<semaphore_mem>> -> memref<!tpu.dma_semaphore, #tpu.memory_space<semaphore_mem>>
    tpu.wait_dma2 semaphore(%150 : memref<!tpu.dma_semaphore, #tpu.memory_space<semaphore_mem>>) src(%147 : memref<1x128xf32, #tpu.memory_space<any>>) dst(%148 : memref<1x128xf32, #tpu.memory_space<vmem>>)
    %c4_i32_104 = arith.constant 4 : i32
    %c8_i32_105 = arith.constant 8 : i32
    %151 = arith.addi %c4_i32_104, %c8_i32_105 : i32
    %c8_i32_106 = arith.constant 8 : i32
    %152 = arith.cmpi slt, %151, %c8_i32_106 : i32
    %153 = arith.extui %152 : i1 to i32
    %c0_i32_107 = arith.constant 0 : i32
    %154 = arith.cmpi ne, %153, %c0_i32_107 : i32
    scf.if %154 {
      %c8_i32_157 = arith.constant 8 : i32
      %223 = arith.addi %c4_i32_104, %c8_i32_157 : i32
      %224 = arith.addi %0, %223 : i32
      %225 = arith.index_cast %224 : i32 to index
      %226 = memref.load %arg1[%225] : memref<16xi32, #tpu.memory_space<smem>>
      %c8_i32_158 = arith.constant 8 : i32
      %c0_i32_159 = arith.constant 0 : i32
      %227 = arith.cmpi eq, %c8_i32_158, %c0_i32_159 : i32
      %c1_i32_160 = arith.constant 1 : i32
      %228 = arith.select %227, %c1_i32_160, %c8_i32_158 : i32
      %229 = arith.remsi %223, %228 : i32
      %c0_i32_161 = arith.constant 0 : i32
      %230 = arith.cmpi ne, %229, %c0_i32_161 : i32
      %c0_i32_162 = arith.constant 0 : i32
      %231 = arith.cmpi slt, %229, %c0_i32_162 : i32
      %c0_i32_163 = arith.constant 0 : i32
      %232 = arith.cmpi slt, %228, %c0_i32_163 : i32
      %233 = arith.xori %231, %232 : i1
      %234 = arith.andi %233, %230 : i1
      %235 = arith.addi %229, %228 : i32
      %236 = arith.select %234, %235, %229 : i32
      %c127_i32_164 = arith.constant 127 : i32
      %237 = arith.cmpi eq, %226, %c127_i32_164 : i32
      %238 = arith.extui %237 : i1 to i32
      %c0_i32_165 = arith.constant 0 : i32
      %239 = arith.cmpi ne, %238, %c0_i32_165 : i32
      scf.if %239 {
        %c0_i32_168 = arith.constant 0 : i32
        %243 = tpu.memref_slice %arg3[%223, %c0_i32_168] : memref<8x128xf32, #tpu.memory_space<vmem>> -> memref<1x128xf32, #tpu.memory_space<vmem>>
        %244 = tpu.memref_slice %arg5[%236] : memref<9x!tpu.dma_semaphore, #tpu.memory_space<semaphore_mem>> -> memref<1x!tpu.dma_semaphore, #tpu.memory_space<semaphore_mem>>
        %245 = tpu.memref_squeeze %244 : memref<1x!tpu.dma_semaphore, #tpu.memory_space<semaphore_mem>> -> memref<!tpu.dma_semaphore, #tpu.memory_space<semaphore_mem>>
        tpu.enqueue_dma source(%arg4 : memref<1x128xf32, #tpu.memory_space<vmem>>) target(%243 : memref<1x128xf32, #tpu.memory_space<vmem>>) target_semaphore(%245 : memref<!tpu.dma_semaphore, #tpu.memory_space<semaphore_mem>>)
      } else {
      }
      %true_166 = arith.constant true
      %240 = arith.xori %237, %true_166 : i1
      %241 = arith.extui %240 : i1 to i32
      %c0_i32_167 = arith.constant 0 : i32
      %242 = arith.cmpi ne, %241, %c0_i32_167 : i32
      scf.if %242 {
        %c0_i32_168 = arith.constant 0 : i32
        %243 = tpu.memref_slice %arg2[%226, %c0_i32_168] : memref<128x128xf32, #tpu.memory_space<any>> -> memref<1x128xf32, #tpu.memory_space<any>>
        %c0_i32_169 = arith.constant 0 : i32
        %244 = tpu.memref_slice %arg3[%223, %c0_i32_169] : memref<8x128xf32, #tpu.memory_space<vmem>> -> memref<1x128xf32, #tpu.memory_space<vmem>>
        %245 = tpu.memref_slice %arg5[%236] : memref<9x!tpu.dma_semaphore, #tpu.memory_space<semaphore_mem>> -> memref<1x!tpu.dma_semaphore, #tpu.memory_space<semaphore_mem>>
        %246 = tpu.memref_squeeze %245 : memref<1x!tpu.dma_semaphore, #tpu.memory_space<semaphore_mem>> -> memref<!tpu.dma_semaphore, #tpu.memory_space<semaphore_mem>>
        tpu.enqueue_dma source(%243 : memref<1x128xf32, #tpu.memory_space<any>>) target(%244 : memref<1x128xf32, #tpu.memory_space<vmem>>) target_semaphore(%246 : memref<!tpu.dma_semaphore, #tpu.memory_space<semaphore_mem>>)
      } else {
      }
    } else {
    }
    %c8_i32_108 = arith.constant 8 : i32
    %c0_i32_109 = arith.constant 0 : i32
    %155 = arith.cmpi eq, %c8_i32_108, %c0_i32_109 : i32
    %c1_i32_110 = arith.constant 1 : i32
    %156 = arith.select %155, %c1_i32_110, %c8_i32_108 : i32
    %157 = arith.remsi %c4_i32_104, %156 : i32
    %c0_i32_111 = arith.constant 0 : i32
    %158 = arith.cmpi ne, %157, %c0_i32_111 : i32
    %c0_i32_112 = arith.constant 0 : i32
    %159 = arith.cmpi slt, %157, %c0_i32_112 : i32
    %c0_i32_113 = arith.constant 0 : i32
    %160 = arith.cmpi slt, %156, %c0_i32_113 : i32
    %161 = arith.xori %159, %160 : i1
    %162 = arith.andi %161, %158 : i1
    %163 = arith.addi %157, %156 : i32
    %164 = arith.select %162, %163, %157 : i32
    %c0_i32_114 = arith.constant 0 : i32
    %c0_i32_115 = arith.constant 0 : i32
    %165 = tpu.memref_slice %arg2[%c0_i32_114, %c0_i32_115] : memref<128x128xf32, #tpu.memory_space<any>> -> memref<1x128xf32, #tpu.memory_space<any>>
    %c0_i32_116 = arith.constant 0 : i32
    %166 = tpu.memref_slice %arg3[%c4_i32_104, %c0_i32_116] : memref<8x128xf32, #tpu.memory_space<vmem>> -> memref<1x128xf32, #tpu.memory_space<vmem>>
    %167 = tpu.memref_slice %arg5[%164] : memref<9x!tpu.dma_semaphore, #tpu.memory_space<semaphore_mem>> -> memref<1x!tpu.dma_semaphore, #tpu.memory_space<semaphore_mem>>
    %168 = tpu.memref_squeeze %167 : memref<1x!tpu.dma_semaphore, #tpu.memory_space<semaphore_mem>> -> memref<!tpu.dma_semaphore, #tpu.memory_space<semaphore_mem>>
    tpu.wait_dma2 semaphore(%168 : memref<!tpu.dma_semaphore, #tpu.memory_space<semaphore_mem>>) src(%165 : memref<1x128xf32, #tpu.memory_space<any>>) dst(%166 : memref<1x128xf32, #tpu.memory_space<vmem>>)
    %c5_i32_117 = arith.constant 5 : i32
    %c8_i32_118 = arith.constant 8 : i32
    %169 = arith.addi %c5_i32_117, %c8_i32_118 : i32
    %c8_i32_119 = arith.constant 8 : i32
    %170 = arith.cmpi slt, %169, %c8_i32_119 : i32
    %171 = arith.extui %170 : i1 to i32
    %c0_i32_120 = arith.constant 0 : i32
    %172 = arith.cmpi ne, %171, %c0_i32_120 : i32
    scf.if %172 {
      %c8_i32_157 = arith.constant 8 : i32
      %223 = arith.addi %c5_i32_117, %c8_i32_157 : i32
      %224 = arith.addi %0, %223 : i32
      %225 = arith.index_cast %224 : i32 to index
      %226 = memref.load %arg1[%225] : memref<16xi32, #tpu.memory_space<smem>>
      %c8_i32_158 = arith.constant 8 : i32
      %c0_i32_159 = arith.constant 0 : i32
      %227 = arith.cmpi eq, %c8_i32_158, %c0_i32_159 : i32
      %c1_i32_160 = arith.constant 1 : i32
      %228 = arith.select %227, %c1_i32_160, %c8_i32_158 : i32
      %229 = arith.remsi %223, %228 : i32
      %c0_i32_161 = arith.constant 0 : i32
      %230 = arith.cmpi ne, %229, %c0_i32_161 : i32
      %c0_i32_162 = arith.constant 0 : i32
      %231 = arith.cmpi slt, %229, %c0_i32_162 : i32
      %c0_i32_163 = arith.constant 0 : i32
      %232 = arith.cmpi slt, %228, %c0_i32_163 : i32
      %233 = arith.xori %231, %232 : i1
      %234 = arith.andi %233, %230 : i1
      %235 = arith.addi %229, %228 : i32
      %236 = arith.select %234, %235, %229 : i32
      %c127_i32_164 = arith.constant 127 : i32
      %237 = arith.cmpi eq, %226, %c127_i32_164 : i32
      %238 = arith.extui %237 : i1 to i32
      %c0_i32_165 = arith.constant 0 : i32
      %239 = arith.cmpi ne, %238, %c0_i32_165 : i32
      scf.if %239 {
        %c0_i32_168 = arith.constant 0 : i32
        %243 = tpu.memref_slice %arg3[%223, %c0_i32_168] : memref<8x128xf32, #tpu.memory_space<vmem>> -> memref<1x128xf32, #tpu.memory_space<vmem>>
        %244 = tpu.memref_slice %arg5[%236] : memref<9x!tpu.dma_semaphore, #tpu.memory_space<semaphore_mem>> -> memref<1x!tpu.dma_semaphore, #tpu.memory_space<semaphore_mem>>
        %245 = tpu.memref_squeeze %244 : memref<1x!tpu.dma_semaphore, #tpu.memory_space<semaphore_mem>> -> memref<!tpu.dma_semaphore, #tpu.memory_space<semaphore_mem>>
        tpu.enqueue_dma source(%arg4 : memref<1x128xf32, #tpu.memory_space<vmem>>) target(%243 : memref<1x128xf32, #tpu.memory_space<vmem>>) target_semaphore(%245 : memref<!tpu.dma_semaphore, #tpu.memory_space<semaphore_mem>>)
      } else {
      }
      %true_166 = arith.constant true
      %240 = arith.xori %237, %true_166 : i1
      %241 = arith.extui %240 : i1 to i32
      %c0_i32_167 = arith.constant 0 : i32
      %242 = arith.cmpi ne, %241, %c0_i32_167 : i32
      scf.if %242 {
        %c0_i32_168 = arith.constant 0 : i32
        %243 = tpu.memref_slice %arg2[%226, %c0_i32_168] : memref<128x128xf32, #tpu.memory_space<any>> -> memref<1x128xf32, #tpu.memory_space<any>>
        %c0_i32_169 = arith.constant 0 : i32
        %244 = tpu.memref_slice %arg3[%223, %c0_i32_169] : memref<8x128xf32, #tpu.memory_space<vmem>> -> memref<1x128xf32, #tpu.memory_space<vmem>>
        %245 = tpu.memref_slice %arg5[%236] : memref<9x!tpu.dma_semaphore, #tpu.memory_space<semaphore_mem>> -> memref<1x!tpu.dma_semaphore, #tpu.memory_space<semaphore_mem>>
        %246 = tpu.memref_squeeze %245 : memref<1x!tpu.dma_semaphore, #tpu.memory_space<semaphore_mem>> -> memref<!tpu.dma_semaphore, #tpu.memory_space<semaphore_mem>>
        tpu.enqueue_dma source(%243 : memref<1x128xf32, #tpu.memory_space<any>>) target(%244 : memref<1x128xf32, #tpu.memory_space<vmem>>) target_semaphore(%246 : memref<!tpu.dma_semaphore, #tpu.memory_space<semaphore_mem>>)
      } else {
      }
    } else {
    }
    %c8_i32_121 = arith.constant 8 : i32
    %c0_i32_122 = arith.constant 0 : i32
    %173 = arith.cmpi eq, %c8_i32_121, %c0_i32_122 : i32
    %c1_i32_123 = arith.constant 1 : i32
    %174 = arith.select %173, %c1_i32_123, %c8_i32_121 : i32
    %175 = arith.remsi %c5_i32_117, %174 : i32
    %c0_i32_124 = arith.constant 0 : i32
    %176 = arith.cmpi ne, %175, %c0_i32_124 : i32
    %c0_i32_125 = arith.constant 0 : i32
    %177 = arith.cmpi slt, %175, %c0_i32_125 : i32
    %c0_i32_126 = arith.constant 0 : i32
    %178 = arith.cmpi slt, %174, %c0_i32_126 : i32
    %179 = arith.xori %177, %178 : i1
    %180 = arith.andi %179, %176 : i1
    %181 = arith.addi %175, %174 : i32
    %182 = arith.select %180, %181, %175 : i32
    %c0_i32_127 = arith.constant 0 : i32
    %c0_i32_128 = arith.constant 0 : i32
    %183 = tpu.memref_slice %arg2[%c0_i32_127, %c0_i32_128] : memref<128x128xf32, #tpu.memory_space<any>> -> memref<1x128xf32, #tpu.memory_space<any>>
    %c0_i32_129 = arith.constant 0 : i32
    %184 = tpu.memref_slice %arg3[%c5_i32_117, %c0_i32_129] : memref<8x128xf32, #tpu.memory_space<vmem>> -> memref<1x128xf32, #tpu.memory_space<vmem>>
    %185 = tpu.memref_slice %arg5[%182] : memref<9x!tpu.dma_semaphore, #tpu.memory_space<semaphore_mem>> -> memref<1x!tpu.dma_semaphore, #tpu.memory_space<semaphore_mem>>
    %186 = tpu.memref_squeeze %185 : memref<1x!tpu.dma_semaphore, #tpu.memory_space<semaphore_mem>> -> memref<!tpu.dma_semaphore, #tpu.memory_space<semaphore_mem>>
    tpu.wait_dma2 semaphore(%186 : memref<!tpu.dma_semaphore, #tpu.memory_space<semaphore_mem>>) src(%183 : memref<1x128xf32, #tpu.memory_space<any>>) dst(%184 : memref<1x128xf32, #tpu.memory_space<vmem>>)
    %c6_i32_130 = arith.constant 6 : i32
    %c8_i32_131 = arith.constant 8 : i32
    %187 = arith.addi %c6_i32_130, %c8_i32_131 : i32
    %c8_i32_132 = arith.constant 8 : i32
    %188 = arith.cmpi slt, %187, %c8_i32_132 : i32
    %189 = arith.extui %188 : i1 to i32
    %c0_i32_133 = arith.constant 0 : i32
    %190 = arith.cmpi ne, %189, %c0_i32_133 : i32
    scf.if %190 {
      %c8_i32_157 = arith.constant 8 : i32
      %223 = arith.addi %c6_i32_130, %c8_i32_157 : i32
      %224 = arith.addi %0, %223 : i32
      %225 = arith.index_cast %224 : i32 to index
      %226 = memref.load %arg1[%225] : memref<16xi32, #tpu.memory_space<smem>>
      %c8_i32_158 = arith.constant 8 : i32
      %c0_i32_159 = arith.constant 0 : i32
      %227 = arith.cmpi eq, %c8_i32_158, %c0_i32_159 : i32
      %c1_i32_160 = arith.constant 1 : i32
      %228 = arith.select %227, %c1_i32_160, %c8_i32_158 : i32
      %229 = arith.remsi %223, %228 : i32
      %c0_i32_161 = arith.constant 0 : i32
      %230 = arith.cmpi ne, %229, %c0_i32_161 : i32
      %c0_i32_162 = arith.constant 0 : i32
      %231 = arith.cmpi slt, %229, %c0_i32_162 : i32
      %c0_i32_163 = arith.constant 0 : i32
      %232 = arith.cmpi slt, %228, %c0_i32_163 : i32
      %233 = arith.xori %231, %232 : i1
      %234 = arith.andi %233, %230 : i1
      %235 = arith.addi %229, %228 : i32
      %236 = arith.select %234, %235, %229 : i32
      %c127_i32_164 = arith.constant 127 : i32
      %237 = arith.cmpi eq, %226, %c127_i32_164 : i32
      %238 = arith.extui %237 : i1 to i32
      %c0_i32_165 = arith.constant 0 : i32
      %239 = arith.cmpi ne, %238, %c0_i32_165 : i32
      scf.if %239 {
        %c0_i32_168 = arith.constant 0 : i32
        %243 = tpu.memref_slice %arg3[%223, %c0_i32_168] : memref<8x128xf32, #tpu.memory_space<vmem>> -> memref<1x128xf32, #tpu.memory_space<vmem>>
        %244 = tpu.memref_slice %arg5[%236] : memref<9x!tpu.dma_semaphore, #tpu.memory_space<semaphore_mem>> -> memref<1x!tpu.dma_semaphore, #tpu.memory_space<semaphore_mem>>
        %245 = tpu.memref_squeeze %244 : memref<1x!tpu.dma_semaphore, #tpu.memory_space<semaphore_mem>> -> memref<!tpu.dma_semaphore, #tpu.memory_space<semaphore_mem>>
        tpu.enqueue_dma source(%arg4 : memref<1x128xf32, #tpu.memory_space<vmem>>) target(%243 : memref<1x128xf32, #tpu.memory_space<vmem>>) target_semaphore(%245 : memref<!tpu.dma_semaphore, #tpu.memory_space<semaphore_mem>>)
      } else {
      }
      %true_166 = arith.constant true
      %240 = arith.xori %237, %true_166 : i1
      %241 = arith.extui %240 : i1 to i32
      %c0_i32_167 = arith.constant 0 : i32
      %242 = arith.cmpi ne, %241, %c0_i32_167 : i32
      scf.if %242 {
        %c0_i32_168 = arith.constant 0 : i32
        %243 = tpu.memref_slice %arg2[%226, %c0_i32_168] : memref<128x128xf32, #tpu.memory_space<any>> -> memref<1x128xf32, #tpu.memory_space<any>>
        %c0_i32_169 = arith.constant 0 : i32
        %244 = tpu.memref_slice %arg3[%223, %c0_i32_169] : memref<8x128xf32, #tpu.memory_space<vmem>> -> memref<1x128xf32, #tpu.memory_space<vmem>>
        %245 = tpu.memref_slice %arg5[%236] : memref<9x!tpu.dma_semaphore, #tpu.memory_space<semaphore_mem>> -> memref<1x!tpu.dma_semaphore, #tpu.memory_space<semaphore_mem>>
        %246 = tpu.memref_squeeze %245 : memref<1x!tpu.dma_semaphore, #tpu.memory_space<semaphore_mem>> -> memref<!tpu.dma_semaphore, #tpu.memory_space<semaphore_mem>>
        tpu.enqueue_dma source(%243 : memref<1x128xf32, #tpu.memory_space<any>>) target(%244 : memref<1x128xf32, #tpu.memory_space<vmem>>) target_semaphore(%246 : memref<!tpu.dma_semaphore, #tpu.memory_space<semaphore_mem>>)
      } else {
      }
    } else {
    }
    %c8_i32_134 = arith.constant 8 : i32
    %c0_i32_135 = arith.constant 0 : i32
    %191 = arith.cmpi eq, %c8_i32_134, %c0_i32_135 : i32
    %c1_i32_136 = arith.constant 1 : i32
    %192 = arith.select %191, %c1_i32_136, %c8_i32_134 : i32
    %193 = arith.remsi %c6_i32_130, %192 : i32
    %c0_i32_137 = arith.constant 0 : i32
    %194 = arith.cmpi ne, %193, %c0_i32_137 : i32
    %c0_i32_138 = arith.constant 0 : i32
    %195 = arith.cmpi slt, %193, %c0_i32_138 : i32
    %c0_i32_139 = arith.constant 0 : i32
    %196 = arith.cmpi slt, %192, %c0_i32_139 : i32
    %197 = arith.xori %195, %196 : i1
    %198 = arith.andi %197, %194 : i1
    %199 = arith.addi %193, %192 : i32
    %200 = arith.select %198, %199, %193 : i32
    %c0_i32_140 = arith.constant 0 : i32
    %c0_i32_141 = arith.constant 0 : i32
    %201 = tpu.memref_slice %arg2[%c0_i32_140, %c0_i32_141] : memref<128x128xf32, #tpu.memory_space<any>> -> memref<1x128xf32, #tpu.memory_space<any>>
    %c0_i32_142 = arith.constant 0 : i32
    %202 = tpu.memref_slice %arg3[%c6_i32_130, %c0_i32_142] : memref<8x128xf32, #tpu.memory_space<vmem>> -> memref<1x128xf32, #tpu.memory_space<vmem>>
    %203 = tpu.memref_slice %arg5[%200] : memref<9x!tpu.dma_semaphore, #tpu.memory_space<semaphore_mem>> -> memref<1x!tpu.dma_semaphore, #tpu.memory_space<semaphore_mem>>
    %204 = tpu.memref_squeeze %203 : memref<1x!tpu.dma_semaphore, #tpu.memory_space<semaphore_mem>> -> memref<!tpu.dma_semaphore, #tpu.memory_space<semaphore_mem>>
    tpu.wait_dma2 semaphore(%204 : memref<!tpu.dma_semaphore, #tpu.memory_space<semaphore_mem>>) src(%201 : memref<1x128xf32, #tpu.memory_space<any>>) dst(%202 : memref<1x128xf32, #tpu.memory_space<vmem>>)
    %c7_i32_143 = arith.constant 7 : i32
    %c8_i32_144 = arith.constant 8 : i32
    %205 = arith.addi %c7_i32_143, %c8_i32_144 : i32
    %c8_i32_145 = arith.constant 8 : i32
    %206 = arith.cmpi slt, %205, %c8_i32_145 : i32
    %207 = arith.extui %206 : i1 to i32
    %c0_i32_146 = arith.constant 0 : i32
    %208 = arith.cmpi ne, %207, %c0_i32_146 : i32
    scf.if %208 {
      %c8_i32_157 = arith.constant 8 : i32
      %223 = arith.addi %c7_i32_143, %c8_i32_157 : i32
      %224 = arith.addi %0, %223 : i32
      %225 = arith.index_cast %224 : i32 to index
      %226 = memref.load %arg1[%225] : memref<16xi32, #tpu.memory_space<smem>>
      %c8_i32_158 = arith.constant 8 : i32
      %c0_i32_159 = arith.constant 0 : i32
      %227 = arith.cmpi eq, %c8_i32_158, %c0_i32_159 : i32
      %c1_i32_160 = arith.constant 1 : i32
      %228 = arith.select %227, %c1_i32_160, %c8_i32_158 : i32
      %229 = arith.remsi %223, %228 : i32
      %c0_i32_161 = arith.constant 0 : i32
      %230 = arith.cmpi ne, %229, %c0_i32_161 : i32
      %c0_i32_162 = arith.constant 0 : i32
      %231 = arith.cmpi slt, %229, %c0_i32_162 : i32
      %c0_i32_163 = arith.constant 0 : i32
      %232 = arith.cmpi slt, %228, %c0_i32_163 : i32
      %233 = arith.xori %231, %232 : i1
      %234 = arith.andi %233, %230 : i1
      %235 = arith.addi %229, %228 : i32
      %236 = arith.select %234, %235, %229 : i32
      %c127_i32_164 = arith.constant 127 : i32
      %237 = arith.cmpi eq, %226, %c127_i32_164 : i32
      %238 = arith.extui %237 : i1 to i32
      %c0_i32_165 = arith.constant 0 : i32
      %239 = arith.cmpi ne, %238, %c0_i32_165 : i32
      scf.if %239 {
        %c0_i32_168 = arith.constant 0 : i32
        %243 = tpu.memref_slice %arg3[%223, %c0_i32_168] : memref<8x128xf32, #tpu.memory_space<vmem>> -> memref<1x128xf32, #tpu.memory_space<vmem>>
        %244 = tpu.memref_slice %arg5[%236] : memref<9x!tpu.dma_semaphore, #tpu.memory_space<semaphore_mem>> -> memref<1x!tpu.dma_semaphore, #tpu.memory_space<semaphore_mem>>
        %245 = tpu.memref_squeeze %244 : memref<1x!tpu.dma_semaphore, #tpu.memory_space<semaphore_mem>> -> memref<!tpu.dma_semaphore, #tpu.memory_space<semaphore_mem>>
        tpu.enqueue_dma source(%arg4 : memref<1x128xf32, #tpu.memory_space<vmem>>) target(%243 : memref<1x128xf32, #tpu.memory_space<vmem>>) target_semaphore(%245 : memref<!tpu.dma_semaphore, #tpu.memory_space<semaphore_mem>>)
      } else {
      }
      %true_166 = arith.constant true
      %240 = arith.xori %237, %true_166 : i1
      %241 = arith.extui %240 : i1 to i32
      %c0_i32_167 = arith.constant 0 : i32
      %242 = arith.cmpi ne, %241, %c0_i32_167 : i32
      scf.if %242 {
        %c0_i32_168 = arith.constant 0 : i32
        %243 = tpu.memref_slice %arg2[%226, %c0_i32_168] : memref<128x128xf32, #tpu.memory_space<any>> -> memref<1x128xf32, #tpu.memory_space<any>>
        %c0_i32_169 = arith.constant 0 : i32
        %244 = tpu.memref_slice %arg3[%223, %c0_i32_169] : memref<8x128xf32, #tpu.memory_space<vmem>> -> memref<1x128xf32, #tpu.memory_space<vmem>>
        %245 = tpu.memref_slice %arg5[%236] : memref<9x!tpu.dma_semaphore, #tpu.memory_space<semaphore_mem>> -> memref<1x!tpu.dma_semaphore, #tpu.memory_space<semaphore_mem>>
        %246 = tpu.memref_squeeze %245 : memref<1x!tpu.dma_semaphore, #tpu.memory_space<semaphore_mem>> -> memref<!tpu.dma_semaphore, #tpu.memory_space<semaphore_mem>>
        tpu.enqueue_dma source(%243 : memref<1x128xf32, #tpu.memory_space<any>>) target(%244 : memref<1x128xf32, #tpu.memory_space<vmem>>) target_semaphore(%246 : memref<!tpu.dma_semaphore, #tpu.memory_space<semaphore_mem>>)
      } else {
      }
    } else {
    }
    %c8_i32_147 = arith.constant 8 : i32
    %c0_i32_148 = arith.constant 0 : i32
    %209 = arith.cmpi eq, %c8_i32_147, %c0_i32_148 : i32
    %c1_i32_149 = arith.constant 1 : i32
    %210 = arith.select %209, %c1_i32_149, %c8_i32_147 : i32
    %211 = arith.remsi %c7_i32_143, %210 : i32
    %c0_i32_150 = arith.constant 0 : i32
    %212 = arith.cmpi ne, %211, %c0_i32_150 : i32
    %c0_i32_151 = arith.constant 0 : i32
    %213 = arith.cmpi slt, %211, %c0_i32_151 : i32
    %c0_i32_152 = arith.constant 0 : i32
    %214 = arith.cmpi slt, %210, %c0_i32_152 : i32
    %215 = arith.xori %213, %214 : i1
    %216 = arith.andi %215, %212 : i1
    %217 = arith.addi %211, %210 : i32
    %218 = arith.select %216, %217, %211 : i32
    %c0_i32_153 = arith.constant 0 : i32
    %c0_i32_154 = arith.constant 0 : i32
    %219 = tpu.memref_slice %arg2[%c0_i32_153, %c0_i32_154] : memref<128x128xf32, #tpu.memory_space<any>> -> memref<1x128xf32, #tpu.memory_space<any>>
    %c0_i32_155 = arith.constant 0 : i32
    %220 = tpu.memref_slice %arg3[%c7_i32_143, %c0_i32_155] : memref<8x128xf32, #tpu.memory_space<vmem>> -> memref<1x128xf32, #tpu.memory_space<vmem>>
    %221 = tpu.memref_slice %arg5[%218] : memref<9x!tpu.dma_semaphore, #tpu.memory_space<semaphore_mem>> -> memref<1x!tpu.dma_semaphore, #tpu.memory_space<semaphore_mem>>
    %222 = tpu.memref_squeeze %221 : memref<1x!tpu.dma_semaphore, #tpu.memory_space<semaphore_mem>> -> memref<!tpu.dma_semaphore, #tpu.memory_space<semaphore_mem>>
    tpu.wait_dma2 semaphore(%222 : memref<!tpu.dma_semaphore, #tpu.memory_space<semaphore_mem>>) src(%219 : memref<1x128xf32, #tpu.memory_space<any>>) dst(%220 : memref<1x128xf32, #tpu.memory_space<vmem>>)
    %c8_i32_156 = arith.constant 8 : i32
    return
  }
  func.func @transform_1(%arg0: i32, %arg1: memref<16xi32, #tpu.memory_space<smem>>) -> (i32, i32) {
    %c0_i32 = arith.constant 0 : i32
    %c0_i32_0 = arith.constant 0 : i32
    return %arg0, %c0_i32 : i32, i32
  }
}

</mosaic_0001>

<bundles_post_ra>
// kernel: tpu_custom_call.1
= control target key start
LH: loop header
LB: loop body
LE: loop exit
PB: predicated region body
PF: predicated region fallthrough
CT: control target
= control target key end

     0   :  { %s402_s9 = smov [#allocation3]   ;;  %s542_s0 = inlined_call_operand.hbm [shape: s32[16], index: 0, kind: input, shape index: {}]   ;;  %s543_s1 = inlined_call_operand.hbm [shape: f32[128,128], index: 1, kind: input, shape index: {}]   ;;  %s544_s2 = inlined_call_operand.hbm [shape: f32[16,128], index: 2, kind: output, shape index: {}]  }
   0x1   :  { %546 = sst [smem:[#allocation11_spill]] %s543_s1 }
   0x2   :  { %8 = dma.hbm_to_smem %s542_s0, 16, %s402_s9, [#allocation2] }
   0x3   :  { %376 = dma.done.wait [#allocation2], 16 }
   0x4   :  { %377 = vsyncadd [#allocation2], 4294967280 }
   0x5   :  { %10 = sfence }
   0x6   :  { %11 = vsyncpa [#allocation5], 0 }
   0x7   :  { %12 = vsyncpa [#allocation6], 0 }
   0x8   :  { %14 = vsyncpa [#allocation6 + $0x1], 0  ;;  %s425_s12 = smov 0   ;;  %s427_s13 = smov 0  }
   0x9   :  { %s429_s14 = smov 0   ;;  %s431_s15 = smov 0  }
   0xa LB: > { %s446_s0 = sadd.s32 4294967295, %s400_s15   ;;  %s236_s16 = sadd.s32 4294967294, %s400_s15   ;;  %s400_s15 = sphi %s431_s15, %s556_s15   ;;  %s396_s14 = sphi %s429_s14, %s555_s14   ;;  %s392_s13 = sphi %s427_s13, %s554_s13   ;;  %s388_s12 = sphi %s425_s12, %s553_s12  }
   0xb   : > { %s450_s17 = sadd.s32 1, %s400_s15   ;;  %s48_s18 = sadd.s32 1, %s396_s14 }
   0xc   : > { %s45_s19 = ssub.s32 %s400_s15, %s450_s17  ;;  %p58_p0 = scmp.ne.s32.totalorder %s396_s14, %s392_s13 }
   0xd   : > { %p46_p1 = scmp.eq.s32.totalorder %s45_s19, 0  ;;  %p59_p2 = scmp.eq.s32.totalorder %s446_s0, 1 }
   0xe   : > { %p64_p3 = scmp.ne.s32.totalorder %s392_s13, %s388_s12  ;;  %p65_p4 = scmp.eq.s32.totalorder %s236_s16, 1 }
   0xf   : > { %s461_s20 = scalar_select %p46_p1, %s396_s14, %s48_s18  }
  0x10   : > { %p463_p5 = por %p59_p2, %p58_p0  ;;  %p467_p6 = por %p65_p4, %p64_p3 }
  0x11   : > { %p237_p7 = scmp.ge.s32.totalorder %s400_s15, 1  ;;  %p72_p8 = scmp.lt.s32.totalorder %s400_s15, 3 }
  0x12   : > { %s548_s22 = scalar_select %p467_p6, 1, 0 }
  0x13   : > { %p261_p9 = scmp.eq.s32.totalorder %s446_s0, 0  ;;  %p474_p10 = pnand %p237_p7, %p72_p8 }
  0x14   : > { %s403_s24 = smov [#allocation4]  }
  0x15   : > { %s84_s25 = sshll.u32 %s403_s24, 4  ;;  %p253_p11 = pneg %p474_p10  ;;  %s85_s25 = int_to_ptr.vmem [resolvable:$true] %s84_s25 }
  0x16   : > { %s319_s26 = scalar_lea.vmem %s85_s25, 2048  ;;  %p327_p3 = scmp.lt.s32.totalorder %s85_s25, %s85_s25 }
  0x17   : > { %p254_p12 = pnand %p261_p9, %p253_p11  ;;  %p320_p0 = scmp.ne.s32.totalorder %s85_s25, %s319_s26 }
  0x18   : > { %p328_p4 = scmp.lt.s32.totalorder %s319_s26, %s319_s26 }
  0x19   : > { %p310_p13 = pneg %p254_p12 }
  0x1a   : > { %p329_p6 = por %p328_p4, %p327_p3 }
  0x1b   : > { %p322_p1 = pnand %p320_p0, %p310_p13 }
  0x1d   : > { %p323_p2 = pneg %p322_p1 }
  0x1f   : > { %p330_p7 = pnand %p329_p6, %p323_p2 }
  0x21   : > { %333 = shalt.err (!%p330_p7)
}
  0x22   : > { %s404_s27 = smov 128   ;;  %s405_s28 = smov 8  }
  0x23   : > { %s550_s1 = sld [smem:[#allocation11_spill]] }
  0x25   : > { %100 = sbr.rel (%p474_p10) target bundleno = 81 (0x51), region = 24 }
  0x29   : > { %256 = dma.hbm_to_vmem [thread:$0]  (!%p254_p12), %s550_s1, 2048, %s85_s25, [#allocation5], %s404_s27, %s404_s27, %s405_s28  }
  0x2a   : > { %379 = dma.done.wait (%p261_p9), [#allocation5], 2048  }
  0x2b   : > { %381 = vsyncadd (%p261_p9), [#allocation5], 4294965248  ;;  %s545_s3 = sand.u32 1, %s392_s13   ;;  %s242_s4 = sshll.u32 %s446_s0, 3 }
  0x2c   : > { %s241_s5 = sshll.u32 %s545_s3, 3  ;;  %s116_s6 = sld [smem:[#allocation3 + %s242_s4]] }
  0x2d   : > { %s120_s7 = sadd.s32 1, %s242_s4  ;;  %s125_s8 = sadd.s32 2, %s242_s4 }
  0x2e   : > { %s121_s9 = sld [smem:[#allocation3 + %s120_s7]]  ;;  %s130_s10 = sadd.s32 3, %s242_s4 }
  0x2f   : > { %s126_s11 = sld [smem:[#allocation3 + %s125_s8]]  ;;  %s135_s16 = sadd.s32 4, %s242_s4 }
  0x30   : > { %s131_s18 = sld [smem:[#allocation3 + %s130_s10]]  ;;  %s140_s19 = sadd.s32 5, %s242_s4 }
  0x31   : > { %s136_s23 = sld [smem:[#allocation3 + %s135_s16]]  ;;  %s145_s26 = sadd.s32 6, %s242_s4 }
  0x32   : > { %s117_s24 = scalar_lea.vmem [#allocation4], %s116_s6  ;;  %s141_s25 = sld [smem:[#allocation3 + %s140_s19]] }
  0x33   : > { %v118_v0 = vld [vmem:[%s117_s24] sm:$0x1]  ;;  %s114_s27 = scalar_lea.vmem [#allocation7], %s241_s5  ;;  %s146_s28 = sld [smem:[#allocation3 + %s145_s26]] }
  0x34   : > { %119 = vst [vmem:[%s114_s27] sm:$0x1] %v118_v0  ;;  %s150_s29 = sadd.s32 7, %s242_s4  ;;  %s122_s3 = scalar_lea.vmem [#allocation4], %s121_s9 }
  0x35   : > { %s151_s30 = sld [smem:[#allocation3 + %s150_s29]]  ;;  %v123_v1 = vld [vmem:[%s122_s3] sm:$0x1]  ;;  %s127_s7 = scalar_lea.vmem [#allocation4], %s126_s11 }
  0x36   : > { %124 = vst [vmem:[%s114_s27 + $0x1] sm:$0x1] %v123_v1  ;;  %v128_v2 = vld [vmem:[%s127_s7] sm:$0x1]  ;;  %s244_s8 = sshll.u32 %s446_s0, 7  ;;  %s132_s10 = scalar_lea.vmem [#allocation4], %s131_s18 }
  0x37   : > { %129 = vst [vmem:[%s114_s27 + $0x2] sm:$0x1] %v128_v2  ;;  %v133_v3 = vld [vmem:[%s132_s10] sm:$0x1]  ;;  %s169_s1 = sshll.u32 %s114_s27, 4  ;;  %s137_s6 = scalar_lea.vmem [#allocation4], %s136_s23  ;;  %s501_s1 = int_to_ptr.vmem [resolvable:$true] %s169_s1 }
  0x38   : > { %134 = vst [vmem:[%s114_s27 + $0x3] sm:$0x1] %v133_v3  ;;  %v138_v4 = vld [vmem:[%s137_s6] sm:$0x1]  ;;  %s142_s5 = scalar_lea.vmem [#allocation4], %s141_s25  ;;  %s499_s3 = scalar_lea.hbm %s544_s2, %s244_s8 }
  0x39   : > { %139 = vst [vmem:[%s114_s27 + $0x4] sm:$0x1] %v138_v4  ;;  %v143_v5 = vld [vmem:[%s142_s5] sm:$0x1]  ;;  %s147_s9 = scalar_lea.vmem [#allocation4], %s146_s28  ;;  %s551_s11 = sand.u32 1, %s392_s13  }
  0x3a   : > { %144 = vst [vmem:[%s114_s27 + $0x5] sm:$0x1] %v143_v5  ;;  %v148_v6 = vld [vmem:[%s147_s9] sm:$0x1]  ;;  %s156_s18 = scalar_lea.sflag [#allocation6], %s551_s11  ;;  %s334_s19 = scalar_lea.vmem %s501_s1, 128 }
  0x3b   : > { %149 = vst [vmem:[%s114_s27 + $0x6] sm:$0x1] %v148_v6  ;;  %s152_s0 = scalar_lea.vmem [#allocation4], %s151_s30  ;;  %p335_p6 = scmp.ne.s32.totalorder %s501_s1, %s334_s19 }
  0x3c   : > { %v153_v7 = vld [vmem:[%s152_s0] sm:$0x1]  ;;  %s406_s23 = smov [#allocation7]  }
  0x3d   : > { %154 = vst [vmem:[%s114_s27 + $0x7] sm:$0x1] %v153_v7  ;;  %p336_p8 = pnand %p335_p6, %p463_p5  ;;  %s338_s24 = sshll.u32 %s406_s23, 4  ;;  %s339_s24 = int_to_ptr.vmem [resolvable:$false] %s338_s24 }
  0x3e   : > { %s340_s25 = scalar_lea.vmem %s339_s24, 256  ;;  %p341_p10 = scmp.lt.s32.totalorder %s501_s1, %s339_s24 }
  0x3f   : > { %p337_p9 = pneg %p336_p8  ;;  %p342_p11 = scmp.lt.s32.totalorder %s340_s25, %s334_s19 }
  0x41   : > { %p343_p12 = por %p342_p11, %p341_p10 }
  0x43   : > { %p344_p13 = pnand %p343_p12, %p337_p9 }
  0x45   : > { %347 = shalt.err (!%p344_p13)
}
  0x46   : > { %s348_s26 = scalar_lea.hbm %s499_s3, 128  ;;  %s352_s29 = scalar_lea.hbm %s544_s2, 256 }
  0x47   : > { %p349_p0 = scmp.ne.s32.totalorder %s499_s3, %s348_s26  ;;  %p353_p3 = scmp.lt.s32.totalorder %s499_s3, %s544_s2 }
  0x48   : > { %p354_p4 = scmp.lt.s32.totalorder %s352_s29, %s348_s26 }
  0x49   : > { %p350_p1 = pnand %p349_p0, %p463_p5 }
  0x4a   : > { %p355_p7 = por %p354_p4, %p353_p3 }
  0x4b   : > { %p351_p2 = pneg %p350_p1 }
  0x4d   : > { %p356_p6 = pnand %p355_p7, %p351_p2 }
  0x4f   : > { %359 = shalt.err (!%p356_p6)
}
  0x50   : > { %251 = dma.vmem_to_hbm [thread:$0]  (%p463_p5), %s501_s1, 128, %s499_s3, %s156_s18  }
  0x51 PF: > { %p263_p8 = scmp.ge.s32.totalorder %s400_s15, 2  ;;  %s181_s8 = sand.u32 1, %s388_s12  }
  0x52   : > { %p552_p9 = scmp.ne.s32.totalorder %s548_s22, 0  ;;  %s182_s10 = scalar_lea.sflag [#allocation6], %s181_s8 }
  0x54   : > { %p258_p10 = pnand %p263_p8, %p552_p9 }
  0x56   : > { %p259_p11 = pneg %p258_p10 }
  0x58   : > { %383 = dma.done.wait (%p259_p11), %s182_s10, 128  }
  0x59   : > { %385 = vsyncadd (%p259_p11), %s182_s10, 4294967168  ;;  %p17_p12 = scmp.ge.s32.totalorder %s450_s17, 4   ;;  %s553_s12 = smov %s392_s13 }
  0x5a   : > { %s554_s13 = smov %s396_s14  ;;  %s555_s14 = smov %s461_s20 }
  0x5b   : > { %s556_s15 = smov %s450_s17  ;;  %19 = sbr.rel (!%p17_p12) target bundleno = 10 (0xa), region = 69 }
  0x60   :  { %187 = vsyncpa [#allocation5], 1 }
  0x61   :  { %189 = vsyncpa [#allocation5 + $0x1], 1 }
  0x62   :  { %190 = vsyncpa [#allocation6], 1 }
  0x63   :  { %192 = vsyncpa [#allocation6 + $0x1], 1 }

// kernel: tpu_custom_call.1
= control target key start
LH: loop header
LB: loop body
LE: loop exit
PB: predicated region body
PF: predicated region fallthrough
CT: control target
= control target key end

     0   :  { %s1303_s9 = smov [#allocation5]   ;;  %s1622_s0 = inlined_call_operand.hbm [shape: s32[16], index: 0, kind: input, shape index: {}]   ;;  %s1623_s1 = inlined_call_operand.hbm [shape: f32[128,128], index: 1, kind: input, shape index: {}]   ;;  %s1624_s2 = inlined_call_operand.hbm [shape: f32[16,128], index: 2, kind: output, shape index: {}]  }
   0x1   :  { %8 = dma.hbm_to_smem %s1622_s0, 16, %s1303_s9, [#allocation4] }
   0x2   :  { %1267 = dma.done.wait [#allocation4], 16 }
   0x3   :  { %1268 = vsyncadd [#allocation4], 4294967280 }
   0x4   :  { %10 = sfence }
   0x5   :  { %11 = vsyncpa [#allocation7], 0 }
   0x6   :  { %13 = vsyncpa [#allocation7 + $0x1], 0  ;;  %s1324_s12 = smov 0   ;;  %s1326_s13 = smov 0  }
   0x7   :  { %s1328_s14 = smov 0  }
   0x8 LB: > { %s885_s0 = sadd.s32 4294967295, %s1301_s14   ;;  %s1341_s15 = sadd.s32 1, %s1301_s14   ;;  %s1301_s14 = sphi %s1328_s14, %s1632_s14   ;;  %s1297_s13 = sphi %s1326_s13, %s1631_s13   ;;  %s1293_s12 = sphi %s1324_s12, %s1630_s12  }
   0x9   : > { %s22_s16 = ssub.s32 %s1301_s14, %s1341_s15  ;;  %s25_s17 = sadd.s32 1, %s1297_s13 }
   0xa   : > { %p23_p0 = scmp.eq.s32.totalorder %s22_s16, 0  ;;  %p886_p1 = scmp.ne.s32.totalorder %s22_s16, 0 }
   0xb   : > { %p29_p2 = scmp.eq.s32.totalorder %s1301_s14, 1  ;;  %p34_p3 = scmp.ne.s32.totalorder %s1297_s13, %s1293_s12 }
   0xc   : > { %s1350_s18 = scalar_select %p23_p0, %s1297_s13, %s25_s17  }
   0xd   : > { %p1352_p4 = por %p886_p1, %p29_p2  ;;  %p35_p5 = scmp.eq.s32.totalorder %s885_s0, 1 }
   0xe   : > { %p887_p7 = scmp.ge.s32.totalorder %s1301_s14, 2 }
   0xf   : > { %p1356_p6 = por %p35_p5, %p34_p3  ;;  %s49_s21 = sand.u32 (!%p887_p7), 1, %s1297_s13  }
  0x10   : > { %44 = sbr.rel (%p887_p7) target bundleno = 382 (0x17e), region = 12  ;;  %s1363_s22 = sshll.u32 (!%p887_p7), %s1301_s14, 3 }
  0x11   : > { %s1627_s20 = scalar_select %p1356_p6, 1, 0 }
  0x12   : > { %s888_s23 = sshll.u32 (!%p887_p7), %s49_s21, 3  ;;  %s53_s26 = scalar_lea.hbm (!%p887_p7), %s1623_s1, 2032 }
  0x13   : > { %s1304_s27 = smov (!%p887_p7), [#allocation2]  }
  0x14   : > { %s62_s28 = sshll.u32 (!%p887_p7), %s1304_s27, 4  ;;  %s63_s28 = int_to_ptr.vmem [resolvable:$true] %s62_s28 }
  0x15   : > { %s1008_s29 = scalar_lea.vmem %s63_s28, 16  ;;  %p1013_p9 = scmp.lt.s32.totalorder %s63_s28, %s63_s28 }
  0x16   : > { %p1009_p8 = scmp.ne.s32.totalorder %s63_s28, %s1008_s29  ;;  %p1014_p10 = scmp.lt.s32.totalorder %s1008_s29, %s1008_s29 }
  0x18   : > { %p1015_p11 = por %p1014_p10, %p1013_p9 }
  0x1a   : > { %p1016_p12 = pnand %p1015_p11, %p1009_p8 }
  0x1c   : > { %1019 = shalt.err (!%p1016_p12)  }
  0x1d   : > { %65 = dma.hbm_to_vmem [thread:$0]  %s53_s26, 16, %s63_s28, [#allocation3 + $0x8] }
  0x1e   : > { %s1370_s30 = scalar_lea.vmem [#allocation6], %s888_s23 }
  0x1f   : > { %1269 = dma.done.wait [#allocation3 + $0x8], 16 }
  0x20   : > { %1270 = vsyncadd [#allocation3 + $0x8], 4294967280  ;;  %s1373_s3 = sld [smem:[#allocation5 + %s1363_s22]] }
  0x26   : > { %p890_p13 = scmp.ne.s32.totalorder %s1373_s3, 127 }
  0x28   : > { %73 = sbr.rel (%p890_p13) target bundleno = 48 (0x30), region = 20 }
  0x2d   : > { %v92_v0 = vld [vmem:[#allocation2] sm:$0x1] }
  0x2e   : > { %93 = vst [vmem:[%s1370_s30] sm:$0x1] %v92_v0 }
  0x2f   : > { %119 = vsyncadd [#allocation3], 16 }
  0x30 PF: > { %s891_s4 = sshll.u32 %s1373_s3, 4  ;;  %s132_s5 = sshll.u32 %s1370_s30, 4  ;;  %s1384_s5 = int_to_ptr.vmem [resolvable:$true] %s132_s5 }
  0x31   : > { %s124_s8 = scalar_lea.hbm %s1623_s1, %s891_s4  ;;  %s1391_s0 = scalar_lea.hbm %s1623_s1, 2048 }
  0x32   : > { %s1021_s9 = scalar_lea.hbm %s124_s8, 16  ;;  %p1026_p3 = scmp.lt.s32.totalorder %s124_s8, %s1623_s1 }
  0x33   : > { %p1022_p0 = scmp.ne.s32.totalorder %s124_s8, %s1021_s9  ;;  %p1027_p5 = scmp.lt.s32.totalorder %s1391_s0, %s1021_s9 }
  0x35   : > { %p1023_p1 = pnand %p1022_p0, %p890_p13  ;;  %p1028_p7 = por %p1027_p5, %p1026_p3 }
  0x37   : > { %p1024_p2 = pneg %p1023_p1 }
  0x39   : > { %p1029_p8 = pnand %p1028_p7, %p1024_p2 }
  0x3b   : > { %1032 = shalt.err (!%p1029_p8)  }
  0x3c   : > { %s1033_s23 = scalar_lea.vmem %s1384_s5, 16  ;;  %s1305_s24 = smov [#allocation6]  }
  0x3d   : > { %p1034_p9 = scmp.ne.s32.totalorder %s1384_s5, %s1033_s23  ;;  %s1037_s25 = sshll.u32 %s1305_s24, 4  ;;  %s1401_s25 = int_to_ptr.vmem [resolvable:$false] %s1037_s25 }
  0x3e   : > { %s1404_s26 = scalar_lea.vmem %s1401_s25, 256  ;;  %p1625_p12 = scmp.lt.s32.totalorder %s1384_s5, %s1401_s25 }
  0x3f   : > { %p1035_p10 = pnand %p1034_p9, %p890_p13  ;;  %p1041_p0 = scmp.lt.s32.totalorder %s1404_s26, %s1033_s23 }
  0x41   : > { %p1036_p11 = pneg %p1035_p10  ;;  %p1042_p1 = por %p1041_p0, %p1625_p12 }
  0x43   : > { %p1043_p2 = pnand %p1042_p1, %p1036_p11 }
  0x45   : > { %1046 = shalt.err (!%p1043_p2)  }
  0x46   : > { %934 = dma.hbm_to_vmem [thread:$0]  (%p890_p13), %s124_s8, 16, %s1384_s5, [#allocation3] }
  0x47   : > { %s136_s27 = sadd.s32 1, %s1363_s22 }
  0x48   : > { %s1416_s28 = sld [smem:[#allocation5 + %s136_s27]] }
  0x4e   : > { %p892_p3 = scmp.ne.s32.totalorder %s1416_s28, 127 }
  0x50   : > { %141 = sbr.rel (%p892_p3) target bundleno = 88 (0x58), region = 62 }
  0x55   : > { %v162_v1 = vld [vmem:[#allocation2] sm:$0x1] }
  0x56   : > { %894 = vst [vmem:[%s1370_s30 + $0x1] sm:$0x1] %v162_v1 }
  0x57   : > { %189 = vsyncadd [#allocation3 + $0x1], 16 }
  0x58 PF: > { %s895_s29 = sshll.u32 %s1416_s28, 4  ;;  %s195_s3 = scalar_lea.vmem %s1370_s30, 1 [#allocation6] }
  0x59   : > { %s194_s7 = scalar_lea.hbm %s1623_s1, %s895_s29  ;;  %s204_s8 = sshll.u32 %s195_s3, 4  ;;  %s205_s8 = int_to_ptr.vmem [resolvable:$true] %s204_s8 }
  0x5a   : > { %s208_s9 = sadd.s32 2, %s1363_s22  ;;  %s1047_s10 = scalar_lea.hbm %s194_s7, 16 }
  0x5b   : > { %p1048_p13 = scmp.ne.s32.totalorder %s194_s7, %s1047_s10  ;;  %p1052_p8 = scmp.lt.s32.totalorder %s194_s7, %s1623_s1 }
  0x5c   : > { %p1053_p9 = scmp.lt.s32.totalorder %s1391_s0, %s1047_s10 }
  0x5d   : > { %p1049_p5 = pnand %p1048_p13, %p892_p3 }
  0x5e   : > { %p1054_p10 = por %p1053_p9, %p1052_p8 }
  0x5f   : > { %p1050_p7 = pneg %p1049_p5 }
  0x61   : > { %p1055_p11 = pnand %p1054_p10, %p1050_p7 }
  0x63   : > { %1058 = shalt.err (!%p1055_p11)  }
  0x64   : > { %s1059_s17 = scalar_lea.vmem %s205_s8, 16  ;;  %p1066_p12 = scmp.lt.s32.totalorder %s205_s8, %s1401_s25 }
  0x65   : > { %p1060_p0 = scmp.ne.s32.totalorder %s205_s8, %s1059_s17  ;;  %p1067_p6 = scmp.lt.s32.totalorder %s1404_s26, %s1059_s17 }
  0x67   : > { %p1061_p1 = pnand %p1060_p0, %p892_p3  ;;  %p1068_p13 = por %p1067_p6, %p1066_p12 }
  0x69   : > { %p1062_p2 = pneg %p1061_p1 }
  0x6b   : > { %p1069_p5 = pnand %p1068_p13, %p1062_p2 }
  0x6d   : > { %1072 = shalt.err (!%p1069_p5)  }
  0x6e   : > { %936 = dma.hbm_to_vmem [thread:$0]  (%p892_p3), %s194_s7, 16, %s205_s8, [#allocation3 + $0x1] }
  0x6f   : > { %s1440_s23 = sld [smem:[#allocation5 + %s208_s9]] }
  0x75   : > { %p896_p7 = scmp.ne.s32.totalorder %s1440_s23, 127 }
  0x77   : > { %213 = sbr.rel (%p896_p7) target bundleno = 127 (0x7f), region = 104 }
  0x7c   : > { %v234_v2 = vld [vmem:[#allocation2] sm:$0x1] }
  0x7d   : > { %898 = vst [vmem:[%s1370_s30 + $0x2] sm:$0x1] %v234_v2 }
  0x7e   : > { %261 = vsyncadd [#allocation3 + $0x2], 16 }
  0x7f PF: > { %s899_s24 = sshll.u32 %s1440_s23, 4  ;;  %s267_s27 = scalar_lea.vmem %s1370_s30, 2 [#allocation6] }
  0x80   : > { %s266_s3 = scalar_lea.hbm %s1623_s1, %s899_s24  ;;  %s276_s4 = sshll.u32 %s267_s27, 4  ;;  %s277_s4 = int_to_ptr.vmem [resolvable:$true] %s276_s4 }
  0x81   : > { %s280_s6 = sadd.s32 3, %s1363_s22  ;;  %s1073_s7 = scalar_lea.hbm %s266_s3, 16 }
  0x82   : > { %p1074_p6 = scmp.ne.s32.totalorder %s266_s3, %s1073_s7  ;;  %p1078_p8 = scmp.lt.s32.totalorder %s266_s3, %s1623_s1 }
  0x83   : > { %p1079_p9 = scmp.lt.s32.totalorder %s1391_s0, %s1073_s7 }
  0x84   : > { %p1075_p12 = pnand %p1074_p6, %p896_p7 }
  0x85   : > { %p1080_p10 = por %p1079_p9, %p1078_p8 }
  0x86   : > { %p1076_p3 = pneg %p1075_p12 }
  0x88   : > { %p1081_p11 = pnand %p1080_p10, %p1076_p3 }
  0x8a   : > { %1084 = shalt.err (!%p1081_p11)  }
  0x8b   : > { %s1085_s10 = scalar_lea.vmem %s277_s4, 16  ;;  %p1092_p13 = scmp.lt.s32.totalorder %s277_s4, %s1401_s25 }
  0x8c   : > { %p1086_p0 = scmp.ne.s32.totalorder %s277_s4, %s1085_s10  ;;  %p1093_p5 = scmp.lt.s32.totalorder %s1404_s26, %s1085_s10 }
  0x8e   : > { %p1087_p1 = pnand %p1086_p0, %p896_p7  ;;  %p1094_p6 = por %p1093_p5, %p1092_p13 }
  0x90   : > { %p1088_p2 = pneg %p1087_p1 }
  0x92   : > { %p1095_p12 = pnand %p1094_p6, %p1088_p2 }
  0x94   : > { %1098 = shalt.err (!%p1095_p12)  }
  0x95   : > { %938 = dma.hbm_to_vmem [thread:$0]  (%p896_p7), %s266_s3, 16, %s277_s4, [#allocation3 + $0x2] }
  0x96   : > { %s1464_s11 = sld [smem:[#allocation5 + %s280_s6]] }
  0x9c   : > { %p900_p3 = scmp.ne.s32.totalorder %s1464_s11, 127 }
  0x9e   : > { %285 = sbr.rel (%p900_p3) target bundleno = 166 (0xa6), region = 146 }
  0xa3   : > { %v306_v3 = vld [vmem:[#allocation2] sm:$0x1] }
  0xa4   : > { %902 = vst [vmem:[%s1370_s30 + $0x3] sm:$0x1] %v306_v3 }
  0xa5   : > { %333 = vsyncadd [#allocation3 + $0x3], 16 }
  0xa6 PF: > { %s903_s16 = sshll.u32 %s1464_s11, 4  ;;  %s339_s17 = scalar_lea.vmem %s1370_s30, 3 [#allocation6] }
  0xa7   : > { %s338_s27 = scalar_lea.hbm %s1623_s1, %s903_s16  ;;  %s348_s28 = sshll.u32 %s339_s17, 4  ;;  %s349_s28 = int_to_ptr.vmem [resolvable:$true] %s348_s28 }
  0xa8   : > { %s352_s29 = sadd.s32 4, %s1363_s22  ;;  %s1099_s3 = scalar_lea.hbm %s338_s27, 16 }
  0xa9   : > { %p1100_p7 = scmp.ne.s32.totalorder %s338_s27, %s1099_s3  ;;  %p1104_p10 = scmp.lt.s32.totalorder %s338_s27, %s1623_s1 }
  0xaa   : > { %p1105_p11 = scmp.lt.s32.totalorder %s1391_s0, %s1099_s3 }
  0xab   : > { %p1101_p8 = pnand %p1100_p7, %p900_p3 }
  0xac   : > { %p1106_p0 = por %p1105_p11, %p1104_p10 }
  0xad   : > { %p1102_p9 = pneg %p1101_p8 }
  0xaf   : > { %p1107_p1 = pnand %p1106_p0, %p1102_p9 }
  0xb1   : > { %1110 = shalt.err (!%p1107_p1)  }
  0xb2   : > { %s1111_s7 = scalar_lea.vmem %s349_s28, 16  ;;  %p1118_p6 = scmp.lt.s32.totalorder %s349_s28, %s1401_s25 }
  0xb3   : > { %p1112_p2 = scmp.ne.s32.totalorder %s349_s28, %s1111_s7  ;;  %p1119_p12 = scmp.lt.s32.totalorder %s1404_s26, %s1111_s7 }
  0xb5   : > { %p1113_p13 = pnand %p1112_p2, %p900_p3  ;;  %p1120_p7 = por %p1119_p12, %p1118_p6 }
  0xb7   : > { %p1114_p5 = pneg %p1113_p13 }
  0xb9   : > { %p1121_p8 = pnand %p1120_p7, %p1114_p5 }
  0xbb   : > { %1124 = shalt.err (!%p1121_p8)  }
  0xbc   : > { %940 = dma.hbm_to_vmem [thread:$0]  (%p900_p3), %s338_s27, 16, %s349_s28, [#allocation3 + $0x3] }
  0xbd   : > { %s1488_s8 = sld [smem:[#allocation5 + %s352_s29]] }
  0xc3   : > { %p904_p9 = scmp.ne.s32.totalorder %s1488_s8, 127 }
  0xc5   : > { %357 = sbr.rel (%p904_p9) target bundleno = 205 (0xcd), region = 188 }
  0xca   : > { %v378_v4 = vld [vmem:[#allocation2] sm:$0x1] }
  0xcb   : > { %906 = vst [vmem:[%s1370_s30 + $0x4] sm:$0x1] %v378_v4 }
  0xcc   : > { %405 = vsyncadd [#allocation3 + $0x4], 16 }
  0xcd PF: > { %s907_s9 = sshll.u32 %s1488_s8, 4  ;;  %s411_s10 = scalar_lea.vmem %s1370_s30, 4 [#allocation6] }
  0xce   : > { %s410_s17 = scalar_lea.hbm %s1623_s1, %s907_s9  ;;  %s420_s23 = sshll.u32 %s411_s10, 4  ;;  %s421_s23 = int_to_ptr.vmem [resolvable:$true] %s420_s23 }
  0xcf   : > { %s424_s24 = sadd.s32 5, %s1363_s22  ;;  %s1125_s27 = scalar_lea.hbm %s410_s17, 16 }
  0xd0   : > { %p1126_p3 = scmp.ne.s32.totalorder %s410_s17, %s1125_s27  ;;  %p1130_p0 = scmp.lt.s32.totalorder %s410_s17, %s1623_s1 }
  0xd1   : > { %p1131_p1 = scmp.lt.s32.totalorder %s1391_s0, %s1125_s27 }
  0xd2   : > { %p1127_p10 = pnand %p1126_p3, %p904_p9 }
  0xd3   : > { %p1132_p2 = por %p1131_p1, %p1130_p0 }
  0xd4   : > { %p1128_p11 = pneg %p1127_p10 }
  0xd6   : > { %p1133_p13 = pnand %p1132_p2, %p1128_p11 }
  0xd8   : > { %1136 = shalt.err (!%p1133_p13)  }
  0xd9   : > { %s1137_s3 = scalar_lea.vmem %s421_s23, 16  ;;  %p1144_p7 = scmp.lt.s32.totalorder %s421_s23, %s1401_s25 }
  0xda   : > { %p1138_p5 = scmp.ne.s32.totalorder %s421_s23, %s1137_s3  ;;  %p1145_p8 = scmp.lt.s32.totalorder %s1404_s26, %s1137_s3 }
  0xdc   : > { %p1139_p6 = pnand %p1138_p5, %p904_p9  ;;  %p1146_p3 = por %p1145_p8, %p1144_p7 }
  0xde   : > { %p1140_p12 = pneg %p1139_p6 }
  0xe0   : > { %p1147_p10 = pnand %p1146_p3, %p1140_p12 }
  0xe2   : > { %1150 = shalt.err (!%p1147_p10)  }
  0xe3   : > { %942 = dma.hbm_to_vmem [thread:$0]  (%p904_p9), %s410_s17, 16, %s421_s23, [#allocation3 + $0x4] }
  0xe4   : > { %s1512_s4 = sld [smem:[#allocation5 + %s424_s24]] }
  0xea   : > { %p908_p11 = scmp.ne.s32.totalorder %s1512_s4, 127 }
  0xec   : > { %429 = sbr.rel (%p908_p11) target bundleno = 244 (0xf4), region = 230 }
  0xf1   : > { %v450_v5 = vld [vmem:[#allocation2] sm:$0x1] }
  0xf2   : > { %910 = vst [vmem:[%s1370_s30 + $0x5] sm:$0x1] %v450_v5 }
  0xf3   : > { %477 = vsyncadd [#allocation3 + $0x5], 16 }
  0xf4 PF: > { %s911_s6 = sshll.u32 %s1512_s4, 4  ;;  %s483_s7 = scalar_lea.vmem %s1370_s30, 5 [#allocation6] }
  0xf5   : > { %s482_s10 = scalar_lea.hbm %s1623_s1, %s911_s6  ;;  %s492_s11 = sshll.u32 %s483_s7, 4  ;;  %s493_s11 = int_to_ptr.vmem [resolvable:$true] %s492_s11 }
  0xf6   : > { %s496_s16 = sadd.s32 6, %s1363_s22  ;;  %s1151_s17 = scalar_lea.hbm %s482_s10, 16 }
  0xf7   : > { %p1152_p9 = scmp.ne.s32.totalorder %s482_s10, %s1151_s17  ;;  %p1156_p2 = scmp.lt.s32.totalorder %s482_s10, %s1623_s1 }
  0xf8   : > { %p1157_p13 = scmp.lt.s32.totalorder %s1391_s0, %s1151_s17 }
  0xf9   : > { %p1153_p0 = pnand %p1152_p9, %p908_p11 }
  0xfa   : > { %p1158_p5 = por %p1157_p13, %p1156_p2 }
  0xfb   : > { %p1154_p1 = pneg %p1153_p0 }
  0xfd   : > { %p1159_p6 = pnand %p1158_p5, %p1154_p1 }
  0xff   : > { %1162 = shalt.err (!%p1159_p6)  }
 0x100   : > { %s1163_s27 = scalar_lea.vmem %s493_s11, 16  ;;  %p1170_p3 = scmp.lt.s32.totalorder %s493_s11, %s1401_s25 }
 0x101   : > { %p1164_p12 = scmp.ne.s32.totalorder %s493_s11, %s1163_s27  ;;  %p1171_p10 = scmp.lt.s32.totalorder %s1404_s26, %s1163_s27 }
 0x103   : > { %p1165_p7 = pnand %p1164_p12, %p908_p11  ;;  %p1172_p9 = por %p1171_p10, %p1170_p3 }
 0x105   : > { %p1166_p8 = pneg %p1165_p7 }
 0x107   : > { %p1173_p0 = pnand %p1172_p9, %p1166_p8 }
 0x109   : > { %1176 = shalt.err (!%p1173_p0)  }
 0x10a   : > { %944 = dma.hbm_to_vmem [thread:$0]  (%p908_p11), %s482_s10, 16, %s493_s11, [#allocation3 + $0x5] }
 0x10b   : > { %s1536_s28 = sld [smem:[#allocation5 + %s496_s16]] }
 0x111   : > { %p912_p1 = scmp.ne.s32.totalorder %s1536_s28, 127 }
 0x113   : > { %501 = sbr.rel (%p912_p1) target bundleno = 283 (0x11b), region = 272 }
 0x118   : > { %v522_v6 = vld [vmem:[#allocation2] sm:$0x1] }
 0x119   : > { %914 = vst [vmem:[%s1370_s30 + $0x6] sm:$0x1] %v522_v6 }
 0x11a   : > { %549 = vsyncadd [#allocation3 + $0x6], 16 }
 0x11b PF: > { %s915_s29 = sshll.u32 %s1536_s28, 4  ;;  %s555_s3 = scalar_lea.vmem %s1370_s30, 6 [#allocation6] }
 0x11c   : > { %s554_s7 = scalar_lea.hbm %s1623_s1, %s915_s29  ;;  %s564_s8 = sshll.u32 %s555_s3, 4  ;;  %s565_s8 = int_to_ptr.vmem [resolvable:$true] %s564_s8 }
 0x11d   : > { %s568_s9 = sadd.s32 7, %s1363_s22  ;;  %s1177_s10 = scalar_lea.hbm %s554_s7, 16 }
 0x11e   : > { %p1178_p11 = scmp.ne.s32.totalorder %s554_s7, %s1177_s10  ;;  %p1182_p5 = scmp.lt.s32.totalorder %s554_s7, %s1623_s1 }
 0x11f   : > { %p1183_p6 = scmp.lt.s32.totalorder %s1391_s0, %s1177_s10 }
 0x120   : > { %p1179_p2 = pnand %p1178_p11, %p912_p1 }
 0x121   : > { %p1184_p12 = por %p1183_p6, %p1182_p5 }
 0x122   : > { %p1180_p13 = pneg %p1179_p2 }
 0x124   : > { %p1185_p7 = pnand %p1184_p12, %p1180_p13 }
 0x126   : > { %1188 = shalt.err (!%p1185_p7)  }
 0x127   : > { %s1189_s17 = scalar_lea.vmem %s565_s8, 16  ;;  %p1196_p9 = scmp.lt.s32.totalorder %s565_s8, %s1401_s25 }
 0x128   : > { %p1190_p8 = scmp.ne.s32.totalorder %s565_s8, %s1189_s17  ;;  %p1197_p0 = scmp.lt.s32.totalorder %s1404_s26, %s1189_s17 }
 0x12a   : > { %p1191_p3 = pnand %p1190_p8, %p912_p1  ;;  %p1198_p11 = por %p1197_p0, %p1196_p9 }
 0x12c   : > { %p1192_p10 = pneg %p1191_p3 }
 0x12e   : > { %p1199_p2 = pnand %p1198_p11, %p1192_p10 }
 0x130   : > { %1202 = shalt.err (!%p1199_p2)  }
 0x131   : > { %946 = dma.hbm_to_vmem [thread:$0]  (%p912_p1), %s554_s7, 16, %s565_s8, [#allocation3 + $0x6] }
 0x132   : > { %s1560_s22 = sld [smem:[#allocation5 + %s568_s9]] }
 0x138   : > { %p916_p13 = scmp.ne.s32.totalorder %s1560_s22, 127 }
 0x13a   : > { %573 = sbr.rel (%p916_p13) target bundleno = 322 (0x142), region = 314 }
 0x13f   : > { %v594_v7 = vld [vmem:[#allocation2] sm:$0x1] }
 0x140   : > { %918 = vst [vmem:[%s1370_s30 + $0x7] sm:$0x1] %v594_v7 }
 0x141   : > { %621 = vsyncadd [#allocation3 + $0x7], 16 }
 0x142 PF: > { %s919_s23 = sshll.u32 %s1560_s22, 4  ;;  %s627_s24 = scalar_lea.vmem %s1370_s30, 7 [#allocation6] }
 0x143   : > { %s626_s29 = scalar_lea.hbm %s1623_s1, %s919_s23  ;;  %s636_s3 = sshll.u32 %s627_s24, 4  ;;  %s637_s3 = int_to_ptr.vmem [resolvable:$true] %s636_s3 }
 0x144   : > { %s1203_s4 = scalar_lea.hbm %s626_s29, 16  ;;  %p1208_p12 = scmp.lt.s32.totalorder %s626_s29, %s1623_s1 }
 0x145   : > { %p1204_p1 = scmp.ne.s32.totalorder %s626_s29, %s1203_s4  ;;  %p1209_p7 = scmp.lt.s32.totalorder %s1391_s0, %s1203_s4 }
 0x147   : > { %p1205_p5 = pnand %p1204_p1, %p916_p13  ;;  %p1210_p8 = por %p1209_p7, %p1208_p12 }
 0x149   : > { %p1206_p6 = pneg %p1205_p5 }
 0x14b   : > { %p1211_p3 = pnand %p1210_p8, %p1206_p6 }
 0x14d   : > { %1214 = shalt.err (!%p1211_p3)  }
 0x14e   : > { %s1215_s30 = scalar_lea.vmem %s637_s3, 16  ;;  %p1222_p11 = scmp.lt.s32.totalorder %s637_s3, %s1401_s25 }
 0x14f   : > { %p1216_p10 = scmp.ne.s32.totalorder %s637_s3, %s1215_s30  ;;  %p1223_p2 = scmp.lt.s32.totalorder %s1404_s26, %s1215_s30 }
 0x151   : > { %p1217_p9 = pnand %p1216_p10, %p916_p13  ;;  %p1224_p1 = por %p1223_p2, %p1222_p11 }
 0x153   : > { %p1218_p0 = pneg %p1217_p9 }
 0x155   : > { %p1225_p5 = pnand %p1224_p1, %p1218_p0 }
 0x157   : > { %1228 = shalt.err (!%p1225_p5)  }
 0x158   : > { %948 = dma.hbm_to_vmem [thread:$0]  (%p916_p13), %s626_s29, 16, %s637_s3, [#allocation3 + $0x7] }
 0x159   : > { %1271 = dma.done.wait [#allocation3], 16 }
 0x15a   : > { %1272 = vsyncadd [#allocation3], 4294967280 }
 0x15b   : > { %1273 = dma.done.wait [#allocation3 + $0x1], 16 }
 0x15c   : > { %1274 = vsyncadd [#allocation3 + $0x1], 4294967280 }
 0x15d   : > { %1275 = dma.done.wait [#allocation3 + $0x2], 16 }
 0x15e   : > { %1276 = vsyncadd [#allocation3 + $0x2], 4294967280 }
 0x15f   : > { %1277 = dma.done.wait [#allocation3 + $0x3], 16 }
 0x160   : > { %1278 = vsyncadd [#allocation3 + $0x3], 4294967280 }
 0x161   : > { %1279 = dma.done.wait [#allocation3 + $0x4], 16 }
 0x162   : > { %1280 = vsyncadd [#allocation3 + $0x4], 4294967280 }
 0x163   : > { %1281 = dma.done.wait [#allocation3 + $0x5], 16 }
 0x164   : > { %1282 = vsyncadd [#allocation3 + $0x5], 4294967280 }
 0x165   : > { %1283 = dma.done.wait [#allocation3 + $0x6], 16 }
 0x166   : > { %1284 = vsyncadd [#allocation3 + $0x6], 4294967280 }
 0x167   : > { %1285 = dma.done.wait [#allocation3 + $0x7], 16 }
 0x168   : > { %1286 = vsyncadd [#allocation3 + $0x7], 4294967280  ;;  %s921_s0 = sshll.u32 %s1301_s14, 7  ;;  %s664_s11 = scalar_lea.sflag [#allocation7], %s49_s21 }
 0x169   : > { %s675_s10 = scalar_lea.hbm %s1624_s2, %s921_s0  ;;  %s1229_s16 = scalar_lea.vmem %s1384_s5, 128 }
 0x16a   : > { %p1230_p13 = scmp.ne.s32.totalorder %s1384_s5, %s1229_s16  ;;  %p1237_p7 = scmp.lt.s32.totalorder %s1404_s26, %s1229_s16 }
 0x16b   : > { %p1628_p8 = scmp.lt.s32.totalorder %s1384_s5, %s1401_s25 }
 0x16c   : > { %p1231_p6 = pnand %p1230_p13, %p1352_p4 }
 0x16d   : > { %p1238_p3 = por %p1237_p7, %p1628_p8 }
 0x16e   : > { %p1232_p12 = pneg %p1231_p6 }
 0x170   : > { %p1239_p10 = pnand %p1238_p3, %p1232_p12 }
 0x172   : > { %1242 = shalt.err (!%p1239_p10)
}
 0x173   : > { %s1243_s17 = scalar_lea.hbm %s675_s10, 128  ;;  %s1247_s21 = scalar_lea.hbm %s1624_s2, 256 }
 0x174   : > { %p1244_p9 = scmp.ne.s32.totalorder %s675_s10, %s1243_s17  ;;  %p1248_p2 = scmp.lt.s32.totalorder %s675_s10, %s1624_s2 }
 0x175   : > { %p1249_p1 = scmp.lt.s32.totalorder %s1247_s21, %s1243_s17 }
 0x176   : > { %p1245_p0 = pnand %p1244_p9, %p1352_p4 }
 0x177   : > { %p1250_p5 = por %p1249_p1, %p1248_p2 }
 0x178   : > { %p1246_p11 = pneg %p1245_p0 }
 0x17a   : > { %p1251_p13 = pnand %p1250_p5, %p1246_p11 }
 0x17c   : > { %1254 = shalt.err (!%p1251_p13)
}
 0x17d   : > { %949 = dma.vmem_to_hbm [thread:$0]  (%p1352_p4), %s1384_s5, 128, %s675_s10, %s664_s11  }
 0x17e PF: > { %p963_p6 = scmp.ge.s32.totalorder %s1301_s14, 1  ;;  %s689_s25 = sand.u32 1, %s1293_s12  }
 0x17f   : > { %p1629_p12 = scmp.ne.s32.totalorder %s1627_s20, 0  ;;  %s690_s26 = scalar_lea.sflag [#allocation7], %s689_s25 }
 0x181   : > { %p952_p7 = pnand %p963_p6, %p1629_p12 }
 0x183   : > { %p953_p8 = pneg %p952_p7 }
 0x185   : > { %1288 = dma.done.wait (%p953_p8), %s690_s26, 128  }
 0x186   : > { %1290 = vsyncadd (%p953_p8), %s690_s26, 4294967168  ;;  %p16_p3 = scmp.ge.s32.totalorder %s1341_s15, 3   ;;  %s1630_s12 = smov %s1297_s13 }
 0x187   : > { %s1631_s13 = smov %s1350_s18  ;;  %s1632_s14 = smov %s1341_s15 }
 0x188   :  { %18 = sbr.rel (!%p16_p3) target bundleno = 8 (0x8), region = 517 }
 0x18d   :  { %695 = vsyncpa [#allocation7], 1 }
 0x18e   :  { %697 = vsyncpa [#allocation7 + $0x1], 1 }
 0x18f   :  { %698 = vsyncmov [#allocation3] }
 0x192   :  { %s699_s14 = vpop.sfrf %698 }
 0x193   :  { %p924_p4 = scmp.ne.s32.totalorder %s699_s14, 0 }
 0x195   :  { %703 = shalt.err (%p924_p4)  }
 0x196   :  { %705 = vsyncmov [#allocation3 + $0x1] }
 0x199   :  { %s706_s19 = vpop.sfrf %705 }
 0x19a   :  { %p925_p10 = scmp.ne.s32.totalorder %s706_s19, 0 }
 0x19c   :  { %710 = shalt.err (%p925_p10)  }
 0x19d   :  { %712 = vsyncmov [#allocation3 + $0x2] }
 0x1a0   :  { %s713_s20 = vpop.sfrf %712 }
 0x1a1   :  { %p926_p9 = scmp.ne.s32.totalorder %s713_s20, 0 }
 0x1a3   :  { %717 = shalt.err (%p926_p9)  }
 0x1a4   :  { %719 = vsyncmov [#allocation3 + $0x3] }
 0x1a7   :  { %s720_s5 = vpop.sfrf %719 }
 0x1a8   :  { %p927_p0 = scmp.ne.s32.totalorder %s720_s5, 0 }
 0x1aa   :  { %724 = shalt.err (%p927_p0)  }
 0x1ab   :  { %726 = vsyncmov [#allocation3 + $0x4] }
 0x1ae   :  { %s727_s15 = vpop.sfrf %726 }
 0x1af   :  { %p928_p11 = scmp.ne.s32.totalorder %s727_s15, 0 }
 0x1b1   :  { %731 = shalt.err (%p928_p11)  }
 0x1b2   :  { %733 = vsyncmov [#allocation3 + $0x5] }
 0x1b5   :  { %s734_s1 = vpop.sfrf %733 }
 0x1b6   :  { %p929_p2 = scmp.ne.s32.totalorder %s734_s1, 0 }
 0x1b8   :  { %738 = shalt.err (%p929_p2)  }
 0x1b9   :  { %740 = vsyncmov [#allocation3 + $0x6] }
 0x1bc   :  { %s741_s2 = vpop.sfrf %740 }
 0x1bd   :  { %p930_p1 = scmp.ne.s32.totalorder %s741_s2, 0 }
 0x1bf   :  { %745 = shalt.err (%p930_p1)  }
 0x1c0   :  { %747 = vsyncmov [#allocation3 + $0x7] }
 0x1c3   :  { %s748_s12 = vpop.sfrf %747 }
 0x1c4   :  { %p931_p5 = scmp.ne.s32.totalorder %s748_s12, 0 }
 0x1c6   :  { %752 = shalt.err (%p931_p5)  }
 0x1c7   :  { %754 = vsyncmov [#allocation3 + $0x8] }
 0x1ca   :  { %s755_s13 = vpop.sfrf %754 }
 0x1cb   :  { %p932_p13 = scmp.ne.s32.totalorder %s755_s13, 0 }
 0x1cd   :  { %759 = shalt.err (%p932_p13)  }

</bundles_post_ra>
